<compile_context>
chip_gen: v5e
topology: v5e:2x2
jax: 0.10.0
libtpu: 0.0.40
codegen_flags: <defaults>
</compile_context>

<pallas_src>
import functools

import jax
import jax.numpy as jnp
from jax.experimental import pallas as pl
from jax.experimental.pallas import tpu as pltpu


# --------------------------- fused forward kernel ---------------------------
def make_fused_kernel(S, B, H, num_layers):
    """Kernel: multi-layer bidirectional tanh-RNN + output Linear, all in VMEM.

    Input layout: x2d is the time-major flattened sequence, shape (S*B, F),
    row index = t*B + b.  Per layer / direction weights are pre-transposed so
    every matmul is a plain `x @ W`.
    """

    def kernel(*refs):
        # refs = [x2d] + [wih_f, whh_f, b_f, wih_b, whh_b, b_b] * num_layers
        #        + [out_w_t, out_b] + [o_ref] + [xpf, xpb, actf, actb]
        x_ref = refs[0]
        w_refs = refs[1:1 + 6 * num_layers]
        out_w_ref = refs[1 + 6 * num_layers]
        out_b_ref = refs[2 + 6 * num_layers]
        o_ref = refs[3 + 6 * num_layers]
        xpf_ref = refs[4 + 6 * num_layers]   # (S*B, H) hoisted fwd projection
        xpb_ref = refs[5 + 6 * num_layers]   # (S*B, H) hoisted bwd projection
        actf_ref = refs[6 + 6 * num_layers]  # (S*B, H) fwd outputs (next layer in)
        actb_ref = refs[7 + 6 * num_layers]  # (S*B, H) bwd outputs (next layer in)

        h_chunks = []
        for l in range(num_layers):
            wih_f, whh_f, b_f, wih_b, whh_b, b_b = w_refs[6 * l:6 * l + 6]

            # -- hoisted input projection: one MXU matmul per direction ------
            if l == 0:
                xin = x_ref[...]                                   # (S*B, F)
                xpf_ref[...] = (
                    jnp.dot(xin, wih_f[...], preferred_element_type=jnp.float32)
                    + b_f[...])
                xpb_ref[...] = (
                    jnp.dot(xin, wih_b[...], preferred_element_type=jnp.float32)
                    + b_b[...])
            else:
                # Layer input is concat([y_fwd, y_bwd], -1); avoid the concat
                # by splitting W_ih (2H, H) into its two (H, H) halves.
                yf = actf_ref[...]                                 # (S*B, H)
                yb = actb_ref[...]                                 # (S*B, H)
                xpf_ref[...] = (
                    jnp.dot(yf, wih_f[0:H, :], preferred_element_type=jnp.float32)
                    + jnp.dot(yb, wih_f[H:2 * H, :],
                              preferred_element_type=jnp.float32)
                    + b_f[...])
                xpb_ref[...] = (
                    jnp.dot(yf, wih_b[0:H, :], preferred_element_type=jnp.float32)
                    + jnp.dot(yb, wih_b[H:2 * H, :],
                              preferred_element_type=jnp.float32)
                    + b_b[...])

            # -- recurrence: only h @ W_hh + precomputed[t] per step ---------
            Wf = whh_f[...]
            Wb = whh_b[...]
            h_f = jnp.zeros((B, H), jnp.float32)
            h_b = jnp.zeros((B, H), jnp.float32)
            last_layer = l == num_layers - 1
            for t in range(S):                      # static unroll (S small)
                tb = S - 1 - t
                h_f = jnp.tanh(
                    xpf_ref[t * B:(t + 1) * B, :]
                    + jnp.dot(h_f, Wf, preferred_element_type=jnp.float32))
                h_b = jnp.tanh(
                    xpb_ref[tb * B:(tb + 1) * B, :]
                    + jnp.dot(h_b, Wb, preferred_element_type=jnp.float32))
                if not last_layer:
                    # Stage next layer's input in VMEM (never touches HBM).
                    actf_ref[t * B:(t + 1) * B, :] = h_f
                    actb_ref[tb * B:(tb + 1) * B, :] = h_b
            # Final hidden states of this layer (PyTorch h_n ordering
            # [l0_fwd, l0_bwd, l1_fwd, l1_bwd, ...]).
            h_chunks.append(h_f)
            h_chunks.append(h_b)

        # -- fused output Linear:
        #    logits = concat(h_chunks, -1) @ W_out^T + b_out,
        #    done as per-chunk dots to avoid an in-kernel concatenate. --------
        logits = jnp.zeros((B, out_w_ref.shape[1]), jnp.float32) + out_b_ref[...]
        for idx, h in enumerate(h_chunks):
            logits = logits + jnp.dot(
                h, out_w_ref[idx * H:(idx + 1) * H, :],
                preferred_element_type=jnp.float32)
        o_ref[...] = logits.astype(o_ref.dtype)

    return kernel


# ------------------------------- Full forward -------------------------------
@functools.partial(jax.jit, static_argnames=("num_layers", "hidden_dim"))
def tc_base_forward(features, rnn_params, out_w_t, out_b, *, num_layers, hidden_dim):
    """features: (B, S, F) -> logits (B, class_num). cell == 'bi-rnn'."""
    B, S, F = features.shape
    C = out_w_t.shape[1]

    # Time-major flatten on the host: row index = t*B + b.
    x2d = jnp.transpose(features, (1, 0, 2)).reshape(S * B, F)

    flat_w = []
    for l in range(num_layers):
        (wih_f, whh_f, b_f), (wih_b, whh_b, b_b) = rnn_params[l]
        flat_w += [wih_f, whh_f, b_f, wih_b, whh_b, b_b]

    kernel = make_fused_kernel(S, B, hidden_dim, num_layers)
    vmem = pl.BlockSpec(memory_space=pltpu.MemorySpace.VMEM)
    n_in = 1 + len(flat_w) + 2

    return pl.pallas_call(
        kernel,
        out_shape=jax.ShapeDtypeStruct((B, C), jnp.float32),
        in_specs=[vmem] * n_in,
        out_specs=vmem,
        scratch_shapes=[
            pltpu.VMEM((S * B, hidden_dim), jnp.float32),   # xp fwd
            pltpu.VMEM((S * B, hidden_dim), jnp.float32),   # xp bwd
            pltpu.VMEM((S * B, hidden_dim), jnp.float32),   # y fwd (next layer)
            pltpu.VMEM((S * B, hidden_dim), jnp.float32),   # y bwd (next layer)
        ],
    )(x2d, *flat_w, out_w_t, out_b)


# ------------------------- Pure-JAX reference (check) -----------------------
def reference_forward(features, rnn_params, out_w_t, out_b, num_layers, hidden_dim):
    B, S, F = features.shape
    x_seq = jnp.transpose(features, (1, 0, 2))
    h_finals = []
    layer_in = x_seq
    for l in range(num_layers):
        (wih_f, whh_f, b_f), (wih_b, whh_b, b_b) = rnn_params[l]

        def run(seq, wih_t, whh_t, b):
            H = wih_t.shape[1]
            h = jnp.zeros((B, H), jnp.float32)
            ys = []
            for t in range(seq.shape[0]):
                h = jnp.tanh(seq[t] @ wih_t + h @ whh_t + b)
                ys.append(h)
            return jnp.stack(ys, 0), h

        y_f, h_f = run(layer_in, wih_f, whh_f, b_f)
        y_b_rev, h_b = run(layer_in[::-1], wih_b, whh_b, b_b)
        y_b = y_b_rev[::-1]
        layer_in = jnp.concatenate([y_f, y_b], axis=-1)
        h_finals += [h_f, h_b]
    h_n = jnp.stack(h_finals, 0)
    h_out = jnp.transpose(h_n, (1, 0, 2)).reshape(B, num_layers * 2 * hidden_dim)
    return h_out @ out_w_t + out_b


# ------------------------------------ main -----------------------------------
if __name__ == "__main__":
    # Small shapes consistent with the module.
    B, S = 2, 8
    in_features = 16
    hidden_dim = 32
    num_layers = 2
    class_num = 2
    out_hidden_dim = 2 * hidden_dim * num_layers  # bi-rnn

    key = jax.random.PRNGKey(0)
    keys = iter(jax.random.split(key, 64))
    bound = 1.0 / jnp.sqrt(hidden_dim)

    def uni(shape):
        return jax.random.uniform(next(keys), shape, jnp.float32, -bound, bound)

    # Parameters: per layer, per direction: (W_ih^T, W_hh^T, b_ih+b_hh).
    rnn_params = []
    for l in range(num_layers):
        d_in = in_features if l == 0 else 2 * hidden_dim
        dirs = []
        for _d in range(2):
            wih_t = uni((d_in, hidden_dim))
            whh_t = uni((hidden_dim, hidden_dim))
            bias = (uni((hidden_dim,)) + uni((hidden_dim,))).reshape(1, hidden_dim)
            dirs.append((wih_t, whh_t, bias))
        rnn_params.append(tuple(dirs))
    rnn_params = tuple(rnn_params)

    out_w_t = uni((out_hidden_dim, class_num))
    out_b = uni((class_num,)).reshape(1, class_num)

    features = jax.random.normal(next(keys), (B, S, in_features), jnp.float32)

    logits = tc_base_forward(
        features, rnn_params, out_w_t, out_b,
        num_layers=num_layers, hidden_dim=hidden_dim,
    )
    logits = jax.block_until_ready(logits)

    ref = reference_forward(
        features, rnn_params, out_w_t, out_b, num_layers, hidden_dim
    )
    assert logits.shape == (B, class_num)
    assert jnp.allclose(logits, ref, rtol=1e-4, atol=1e-4), (logits, ref)

    print("KERNEL_OK")
</pallas_src>

<mosaic_0001>
module attributes {stable_mosaic.version = 11 : i64} {
  func.func @kernel(%arg0: memref<16x16xf32, #tpu.memory_space<vmem>>, %arg1: memref<16x32xf32, #tpu.memory_space<vmem>>, %arg2: memref<32x32xf32, #tpu.memory_space<vmem>>, %arg3: memref<1x32xf32, #tpu.memory_space<vmem>>, %arg4: memref<16x32xf32, #tpu.memory_space<vmem>>, %arg5: memref<32x32xf32, #tpu.memory_space<vmem>>, %arg6: memref<1x32xf32, #tpu.memory_space<vmem>>, %arg7: memref<64x32xf32, #tpu.memory_space<vmem>>, %arg8: memref<32x32xf32, #tpu.memory_space<vmem>>, %arg9: memref<1x32xf32, #tpu.memory_space<vmem>>, %arg10: memref<64x32xf32, #tpu.memory_space<vmem>>, %arg11: memref<32x32xf32, #tpu.memory_space<vmem>>, %arg12: memref<1x32xf32, #tpu.memory_space<vmem>>, %arg13: memref<128x2xf32, #tpu.memory_space<vmem>>, %arg14: memref<1x2xf32, #tpu.memory_space<vmem>>, %arg15: memref<2x2xf32, #tpu.memory_space<vmem>>, %arg16: memref<16x32xf32, #tpu.memory_space<vmem>>, %arg17: memref<16x32xf32, #tpu.memory_space<vmem>>, %arg18: memref<16x32xf32, #tpu.memory_space<vmem>>, %arg19: memref<16x32xf32, #tpu.memory_space<vmem>>) attributes {dimension_semantics = [], scalar_prefetch = 0 : i64, scratch_operands = 4 : i64, tpu.core_type = #tpu.core_type<tc>} {
    %c0 = arith.constant 0 : index
    %c0_0 = arith.constant 0 : index
    %0 = vector.load %arg0[%c0, %c0_0] : memref<16x16xf32, #tpu.memory_space<vmem>>, vector<16x16xf32>
    %c0_1 = arith.constant 0 : index
    %c0_2 = arith.constant 0 : index
    %1 = vector.load %arg1[%c0_1, %c0_2] : memref<16x32xf32, #tpu.memory_space<vmem>>, vector<16x32xf32>
    %cst = arith.constant dense<0.000000e+00> : vector<16x32xf32>
    %2 = tpu.matmul %0, %1, %cst {dimension_numbers = #tpu.dot_dimension_numbers<[1], [0], [0], [1], [0, 0, 1, 1], [], []>} : vector<16x16xf32>, vector<16x32xf32>, vector<16x32xf32> -> vector<16x32xf32>
    %c0_3 = arith.constant 0 : index
    %c0_4 = arith.constant 0 : index
    %3 = vector.load %arg3[%c0_3, %c0_4] : memref<1x32xf32, #tpu.memory_space<vmem>>, vector<1x32xf32>
    %4 = vector.broadcast %3 : vector<1x32xf32> to vector<16x32xf32>
    %5 = arith.addf %2, %4 : vector<16x32xf32>
    %c0_5 = arith.constant 0 : index
    %c0_6 = arith.constant 0 : index
    %6 = vector.load %arg16[%c0_5, %c0_6] : memref<16x32xf32, #tpu.memory_space<vmem>>, vector<16x32xf32>
    tpu.vector_store %arg16[%c0_5, %c0_6], %5 {strides = array<i32>} : memref<16x32xf32, #tpu.memory_space<vmem>>, vector<16x32xf32>,
    %c0_7 = arith.constant 0 : index
    %c0_8 = arith.constant 0 : index
    %7 = vector.load %arg4[%c0_7, %c0_8] : memref<16x32xf32, #tpu.memory_space<vmem>>, vector<16x32xf32>
    %cst_9 = arith.constant dense<0.000000e+00> : vector<16x32xf32>
    %8 = tpu.matmul %0, %7, %cst_9 {dimension_numbers = #tpu.dot_dimension_numbers<[1], [0], [0], [1], [0, 0, 1, 1], [], []>} : vector<16x16xf32>, vector<16x32xf32>, vector<16x32xf32> -> vector<16x32xf32>
    %c0_10 = arith.constant 0 : index
    %c0_11 = arith.constant 0 : index
    %9 = vector.load %arg6[%c0_10, %c0_11] : memref<1x32xf32, #tpu.memory_space<vmem>>, vector<1x32xf32>
    %10 = vector.broadcast %9 : vector<1x32xf32> to vector<16x32xf32>
    %11 = arith.addf %8, %10 : vector<16x32xf32>
    %c0_12 = arith.constant 0 : index
    %c0_13 = arith.constant 0 : index
    %12 = vector.load %arg17[%c0_12, %c0_13] : memref<16x32xf32, #tpu.memory_space<vmem>>, vector<16x32xf32>
    tpu.vector_store %arg17[%c0_12, %c0_13], %11 {strides = array<i32>} : memref<16x32xf32, #tpu.memory_space<vmem>>, vector<16x32xf32>,
    %c0_14 = arith.constant 0 : index
    %c0_15 = arith.constant 0 : index
    %13 = vector.load %arg2[%c0_14, %c0_15] : memref<32x32xf32, #tpu.memory_space<vmem>>, vector<32x32xf32>
    %c0_16 = arith.constant 0 : index
    %c0_17 = arith.constant 0 : index
    %14 = vector.load %arg5[%c0_16, %c0_17] : memref<32x32xf32, #tpu.memory_space<vmem>>, vector<32x32xf32>
    %cst_18 = arith.constant 0.000000e+00 : f32
    %15 = vector.broadcast %cst_18 : f32 to vector<2x32xf32>
    %cst_19 = arith.constant 0.000000e+00 : f32
    %16 = vector.broadcast %cst_19 : f32 to vector<2x32xf32>
    %c0_20 = arith.constant 0 : index
    %c0_21 = arith.constant 0 : index
    %17 = vector.load %arg16[%c0_20, %c0_21] : memref<16x32xf32, #tpu.memory_space<vmem>>, vector<2x32xf32>
    %cst_22 = arith.constant dense<0.000000e+00> : vector<2x32xf32>
    %18 = tpu.matmul %15, %13, %cst_22 {dimension_numbers = #tpu.dot_dimension_numbers<[1], [0], [0], [1], [0, 0, 1, 1], [], []>} : vector<2x32xf32>, vector<32x32xf32>, vector<2x32xf32> -> vector<2x32xf32>
    %19 = arith.addf %17, %18 : vector<2x32xf32>
    %20 = math.tanh %19 : vector<2x32xf32>
    %c14 = arith.constant 14 : index
    %c0_23 = arith.constant 0 : index
    %21 = vector.load %arg17[%c14, %c0_23] : memref<16x32xf32, #tpu.memory_space<vmem>>, vector<2x32xf32>
    %cst_24 = arith.constant dense<0.000000e+00> : vector<2x32xf32>
    %22 = tpu.matmul %16, %14, %cst_24 {dimension_numbers = #tpu.dot_dimension_numbers<[1], [0], [0], [1], [0, 0, 1, 1], [], []>} : vector<2x32xf32>, vector<32x32xf32>, vector<2x32xf32> -> vector<2x32xf32>
    %23 = arith.addf %21, %22 : vector<2x32xf32>
    %24 = math.tanh %23 : vector<2x32xf32>
    %c0_25 = arith.constant 0 : index
    %c0_26 = arith.constant 0 : index
    %25 = vector.load %arg18[%c0_25, %c0_26] : memref<16x32xf32, #tpu.memory_space<vmem>>, vector<2x32xf32>
    tpu.vector_store %arg18[%c0_25, %c0_26], %20 {strides = array<i32>} : memref<16x32xf32, #tpu.memory_space<vmem>>, vector<2x32xf32>,
    %c14_27 = arith.constant 14 : index
    %c0_28 = arith.constant 0 : index
    %26 = vector.load %arg19[%c14_27, %c0_28] : memref<16x32xf32, #tpu.memory_space<vmem>>, vector<2x32xf32>
    tpu.vector_store %arg19[%c14_27, %c0_28], %24 {strides = array<i32>} : memref<16x32xf32, #tpu.memory_space<vmem>>, vector<2x32xf32>,
    %c2 = arith.constant 2 : index
    %c0_29 = arith.constant 0 : index
    %27 = vector.load %arg16[%c2, %c0_29] : memref<16x32xf32, #tpu.memory_space<vmem>>, vector<2x32xf32>
    %cst_30 = arith.constant dense<0.000000e+00> : vector<2x32xf32>
    %28 = tpu.matmul %20, %13, %cst_30 {dimension_numbers = #tpu.dot_dimension_numbers<[1], [0], [0], [1], [0, 0, 1, 1], [], []>} : vector<2x32xf32>, vector<32x32xf32>, vector<2x32xf32> -> vector<2x32xf32>
    %29 = arith.addf %27, %28 : vector<2x32xf32>
    %30 = math.tanh %29 : vector<2x32xf32>
    %c12 = arith.constant 12 : index
    %c0_31 = arith.constant 0 : index
    %31 = vector.load %arg17[%c12, %c0_31] : memref<16x32xf32, #tpu.memory_space<vmem>>, vector<2x32xf32>
    %cst_32 = arith.constant dense<0.000000e+00> : vector<2x32xf32>
    %32 = tpu.matmul %24, %14, %cst_32 {dimension_numbers = #tpu.dot_dimension_numbers<[1], [0], [0], [1], [0, 0, 1, 1], [], []>} : vector<2x32xf32>, vector<32x32xf32>, vector<2x32xf32> -> vector<2x32xf32>
    %33 = arith.addf %31, %32 : vector<2x32xf32>
    %34 = math.tanh %33 : vector<2x32xf32>
    %c2_33 = arith.constant 2 : index
    %c0_34 = arith.constant 0 : index
    %35 = vector.load %arg18[%c2_33, %c0_34] : memref<16x32xf32, #tpu.memory_space<vmem>>, vector<2x32xf32>
    tpu.vector_store %arg18[%c2_33, %c0_34], %30 {strides = array<i32>} : memref<16x32xf32, #tpu.memory_space<vmem>>, vector<2x32xf32>,
    %c12_35 = arith.constant 12 : index
    %c0_36 = arith.constant 0 : index
    %36 = vector.load %arg19[%c12_35, %c0_36] : memref<16x32xf32, #tpu.memory_space<vmem>>, vector<2x32xf32>
    tpu.vector_store %arg19[%c12_35, %c0_36], %34 {strides = array<i32>} : memref<16x32xf32, #tpu.memory_space<vmem>>, vector<2x32xf32>,
    %c4 = arith.constant 4 : index
    %c0_37 = arith.constant 0 : index
    %37 = vector.load %arg16[%c4, %c0_37] : memref<16x32xf32, #tpu.memory_space<vmem>>, vector<2x32xf32>
    %cst_38 = arith.constant dense<0.000000e+00> : vector<2x32xf32>
    %38 = tpu.matmul %30, %13, %cst_38 {dimension_numbers = #tpu.dot_dimension_numbers<[1], [0], [0], [1], [0, 0, 1, 1], [], []>} : vector<2x32xf32>, vector<32x32xf32>, vector<2x32xf32> -> vector<2x32xf32>
    %39 = arith.addf %37, %38 : vector<2x32xf32>
    %40 = math.tanh %39 : vector<2x32xf32>
    %c10 = arith.constant 10 : index
    %c0_39 = arith.constant 0 : index
    %41 = vector.load %arg17[%c10, %c0_39] : memref<16x32xf32, #tpu.memory_space<vmem>>, vector<2x32xf32>
    %cst_40 = arith.constant dense<0.000000e+00> : vector<2x32xf32>
    %42 = tpu.matmul %34, %14, %cst_40 {dimension_numbers = #tpu.dot_dimension_numbers<[1], [0], [0], [1], [0, 0, 1, 1], [], []>} : vector<2x32xf32>, vector<32x32xf32>, vector<2x32xf32> -> vector<2x32xf32>
    %43 = arith.addf %41, %42 : vector<2x32xf32>
    %44 = math.tanh %43 : vector<2x32xf32>
    %c4_41 = arith.constant 4 : index
    %c0_42 = arith.constant 0 : index
    %45 = vector.load %arg18[%c4_41, %c0_42] : memref<16x32xf32, #tpu.memory_space<vmem>>, vector<2x32xf32>
    tpu.vector_store %arg18[%c4_41, %c0_42], %40 {strides = array<i32>} : memref<16x32xf32, #tpu.memory_space<vmem>>, vector<2x32xf32>,
    %c10_43 = arith.constant 10 : index
    %c0_44 = arith.constant 0 : index
    %46 = vector.load %arg19[%c10_43, %c0_44] : memref<16x32xf32, #tpu.memory_space<vmem>>, vector<2x32xf32>
    tpu.vector_store %arg19[%c10_43, %c0_44], %44 {strides = array<i32>} : memref<16x32xf32, #tpu.memory_space<vmem>>, vector<2x32xf32>,
    %c6 = arith.constant 6 : index
    %c0_45 = arith.constant 0 : index
    %47 = vector.load %arg16[%c6, %c0_45] : memref<16x32xf32, #tpu.memory_space<vmem>>, vector<2x32xf32>
    %cst_46 = arith.constant dense<0.000000e+00> : vector<2x32xf32>
    %48 = tpu.matmul %40, %13, %cst_46 {dimension_numbers = #tpu.dot_dimension_numbers<[1], [0], [0], [1], [0, 0, 1, 1], [], []>} : vector<2x32xf32>, vector<32x32xf32>, vector<2x32xf32> -> vector<2x32xf32>
    %49 = arith.addf %47, %48 : vector<2x32xf32>
    %50 = math.tanh %49 : vector<2x32xf32>
    %c8 = arith.constant 8 : index
    %c0_47 = arith.constant 0 : index
    %51 = vector.load %arg17[%c8, %c0_47] : memref<16x32xf32, #tpu.memory_space<vmem>>, vector<2x32xf32>
    %cst_48 = arith.constant dense<0.000000e+00> : vector<2x32xf32>
    %52 = tpu.matmul %44, %14, %cst_48 {dimension_numbers = #tpu.dot_dimension_numbers<[1], [0], [0], [1], [0, 0, 1, 1], [], []>} : vector<2x32xf32>, vector<32x32xf32>, vector<2x32xf32> -> vector<2x32xf32>
    %53 = arith.addf %51, %52 : vector<2x32xf32>
    %54 = math.tanh %53 : vector<2x32xf32>
    %c6_49 = arith.constant 6 : index
    %c0_50 = arith.constant 0 : index
    %55 = vector.load %arg18[%c6_49, %c0_50] : memref<16x32xf32, #tpu.memory_space<vmem>>, vector<2x32xf32>
    tpu.vector_store %arg18[%c6_49, %c0_50], %50 {strides = array<i32>} : memref<16x32xf32, #tpu.memory_space<vmem>>, vector<2x32xf32>,
    %c8_51 = arith.constant 8 : index
    %c0_52 = arith.constant 0 : index
    %56 = vector.load %arg19[%c8_51, %c0_52] : memref<16x32xf32, #tpu.memory_space<vmem>>, vector<2x32xf32>
    tpu.vector_store %arg19[%c8_51, %c0_52], %54 {strides = array<i32>} : memref<16x32xf32, #tpu.memory_space<vmem>>, vector<2x32xf32>,
    %c8_53 = arith.constant 8 : index
    %c0_54 = arith.constant 0 : index
    %57 = vector.load %arg16[%c8_53, %c0_54] : memref<16x32xf32, #tpu.memory_space<vmem>>, vector<2x32xf32>
    %cst_55 = arith.constant dense<0.000000e+00> : vector<2x32xf32>
    %58 = tpu.matmul %50, %13, %cst_55 {dimension_numbers = #tpu.dot_dimension_numbers<[1], [0], [0], [1], [0, 0, 1, 1], [], []>} : vector<2x32xf32>, vector<32x32xf32>, vector<2x32xf32> -> vector<2x32xf32>
    %59 = arith.addf %57, %58 : vector<2x32xf32>
    %60 = math.tanh %59 : vector<2x32xf32>
    %c6_56 = arith.constant 6 : index
    %c0_57 = arith.constant 0 : index
    %61 = vector.load %arg17[%c6_56, %c0_57] : memref<16x32xf32, #tpu.memory_space<vmem>>, vector<2x32xf32>
    %cst_58 = arith.constant dense<0.000000e+00> : vector<2x32xf32>
    %62 = tpu.matmul %54, %14, %cst_58 {dimension_numbers = #tpu.dot_dimension_numbers<[1], [0], [0], [1], [0, 0, 1, 1], [], []>} : vector<2x32xf32>, vector<32x32xf32>, vector<2x32xf32> -> vector<2x32xf32>
    %63 = arith.addf %61, %62 : vector<2x32xf32>
    %64 = math.tanh %63 : vector<2x32xf32>
    %c8_59 = arith.constant 8 : index
    %c0_60 = arith.constant 0 : index
    %65 = vector.load %arg18[%c8_59, %c0_60] : memref<16x32xf32, #tpu.memory_space<vmem>>, vector<2x32xf32>
    tpu.vector_store %arg18[%c8_59, %c0_60], %60 {strides = array<i32>} : memref<16x32xf32, #tpu.memory_space<vmem>>, vector<2x32xf32>,
    %c6_61 = arith.constant 6 : index
    %c0_62 = arith.constant 0 : index
    %66 = vector.load %arg19[%c6_61, %c0_62] : memref<16x32xf32, #tpu.memory_space<vmem>>, vector<2x32xf32>
    tpu.vector_store %arg19[%c6_61, %c0_62], %64 {strides = array<i32>} : memref<16x32xf32, #tpu.memory_space<vmem>>, vector<2x32xf32>,
    %c10_63 = arith.constant 10 : index
    %c0_64 = arith.constant 0 : index
    %67 = vector.load %arg16[%c10_63, %c0_64] : memref<16x32xf32, #tpu.memory_space<vmem>>, vector<2x32xf32>
    %cst_65 = arith.constant dense<0.000000e+00> : vector<2x32xf32>
    %68 = tpu.matmul %60, %13, %cst_65 {dimension_numbers = #tpu.dot_dimension_numbers<[1], [0], [0], [1], [0, 0, 1, 1], [], []>} : vector<2x32xf32>, vector<32x32xf32>, vector<2x32xf32> -> vector<2x32xf32>
    %69 = arith.addf %67, %68 : vector<2x32xf32>
    %70 = math.tanh %69 : vector<2x32xf32>
    %c4_66 = arith.constant 4 : index
    %c0_67 = arith.constant 0 : index
    %71 = vector.load %arg17[%c4_66, %c0_67] : memref<16x32xf32, #tpu.memory_space<vmem>>, vector<2x32xf32>
    %cst_68 = arith.constant dense<0.000000e+00> : vector<2x32xf32>
    %72 = tpu.matmul %64, %14, %cst_68 {dimension_numbers = #tpu.dot_dimension_numbers<[1], [0], [0], [1], [0, 0, 1, 1], [], []>} : vector<2x32xf32>, vector<32x32xf32>, vector<2x32xf32> -> vector<2x32xf32>
    %73 = arith.addf %71, %72 : vector<2x32xf32>
    %74 = math.tanh %73 : vector<2x32xf32>
    %c10_69 = arith.constant 10 : index
    %c0_70 = arith.constant 0 : index
    %75 = vector.load %arg18[%c10_69, %c0_70] : memref<16x32xf32, #tpu.memory_space<vmem>>, vector<2x32xf32>
    tpu.vector_store %arg18[%c10_69, %c0_70], %70 {strides = array<i32>} : memref<16x32xf32, #tpu.memory_space<vmem>>, vector<2x32xf32>,
    %c4_71 = arith.constant 4 : index
    %c0_72 = arith.constant 0 : index
    %76 = vector.load %arg19[%c4_71, %c0_72] : memref<16x32xf32, #tpu.memory_space<vmem>>, vector<2x32xf32>
    tpu.vector_store %arg19[%c4_71, %c0_72], %74 {strides = array<i32>} : memref<16x32xf32, #tpu.memory_space<vmem>>, vector<2x32xf32>,
    %c12_73 = arith.constant 12 : index
    %c0_74 = arith.constant 0 : index
    %77 = vector.load %arg16[%c12_73, %c0_74] : memref<16x32xf32, #tpu.memory_space<vmem>>, vector<2x32xf32>
    %cst_75 = arith.constant dense<0.000000e+00> : vector<2x32xf32>
    %78 = tpu.matmul %70, %13, %cst_75 {dimension_numbers = #tpu.dot_dimension_numbers<[1], [0], [0], [1], [0, 0, 1, 1], [], []>} : vector<2x32xf32>, vector<32x32xf32>, vector<2x32xf32> -> vector<2x32xf32>
    %79 = arith.addf %77, %78 : vector<2x32xf32>
    %80 = math.tanh %79 : vector<2x32xf32>
    %c2_76 = arith.constant 2 : index
    %c0_77 = arith.constant 0 : index
    %81 = vector.load %arg17[%c2_76, %c0_77] : memref<16x32xf32, #tpu.memory_space<vmem>>, vector<2x32xf32>
    %cst_78 = arith.constant dense<0.000000e+00> : vector<2x32xf32>
    %82 = tpu.matmul %74, %14, %cst_78 {dimension_numbers = #tpu.dot_dimension_numbers<[1], [0], [0], [1], [0, 0, 1, 1], [], []>} : vector<2x32xf32>, vector<32x32xf32>, vector<2x32xf32> -> vector<2x32xf32>
    %83 = arith.addf %81, %82 : vector<2x32xf32>
    %84 = math.tanh %83 : vector<2x32xf32>
    %c12_79 = arith.constant 12 : index
    %c0_80 = arith.constant 0 : index
    %85 = vector.load %arg18[%c12_79, %c0_80] : memref<16x32xf32, #tpu.memory_space<vmem>>, vector<2x32xf32>
    tpu.vector_store %arg18[%c12_79, %c0_80], %80 {strides = array<i32>} : memref<16x32xf32, #tpu.memory_space<vmem>>, vector<2x32xf32>,
    %c2_81 = arith.constant 2 : index
    %c0_82 = arith.constant 0 : index
    %86 = vector.load %arg19[%c2_81, %c0_82] : memref<16x32xf32, #tpu.memory_space<vmem>>, vector<2x32xf32>
    tpu.vector_store %arg19[%c2_81, %c0_82], %84 {strides = array<i32>} : memref<16x32xf32, #tpu.memory_space<vmem>>, vector<2x32xf32>,
    %c14_83 = arith.constant 14 : index
    %c0_84 = arith.constant 0 : index
    %87 = vector.load %arg16[%c14_83, %c0_84] : memref<16x32xf32, #tpu.memory_space<vmem>>, vector<2x32xf32>
    %cst_85 = arith.constant dense<0.000000e+00> : vector<2x32xf32>
    %88 = tpu.matmul %80, %13, %cst_85 {dimension_numbers = #tpu.dot_dimension_numbers<[1], [0], [0], [1], [0, 0, 1, 1], [], []>} : vector<2x32xf32>, vector<32x32xf32>, vector<2x32xf32> -> vector<2x32xf32>
    %89 = arith.addf %87, %88 : vector<2x32xf32>
    %90 = math.tanh %89 : vector<2x32xf32>
    %c0_86 = arith.constant 0 : index
    %c0_87 = arith.constant 0 : index
    %91 = vector.load %arg17[%c0_86, %c0_87] : memref<16x32xf32, #tpu.memory_space<vmem>>, vector<2x32xf32>
    %cst_88 = arith.constant dense<0.000000e+00> : vector<2x32xf32>
    %92 = tpu.matmul %84, %14, %cst_88 {dimension_numbers = #tpu.dot_dimension_numbers<[1], [0], [0], [1], [0, 0, 1, 1], [], []>} : vector<2x32xf32>, vector<32x32xf32>, vector<2x32xf32> -> vector<2x32xf32>
    %93 = arith.addf %91, %92 : vector<2x32xf32>
    %94 = math.tanh %93 : vector<2x32xf32>
    %c14_89 = arith.constant 14 : index
    %c0_90 = arith.constant 0 : index
    %95 = vector.load %arg18[%c14_89, %c0_90] : memref<16x32xf32, #tpu.memory_space<vmem>>, vector<2x32xf32>
    tpu.vector_store %arg18[%c14_89, %c0_90], %90 {strides = array<i32>} : memref<16x32xf32, #tpu.memory_space<vmem>>, vector<2x32xf32>,
    %c0_91 = arith.constant 0 : index
    %c0_92 = arith.constant 0 : index
    %96 = vector.load %arg19[%c0_91, %c0_92] : memref<16x32xf32, #tpu.memory_space<vmem>>, vector<2x32xf32>
    tpu.vector_store %arg19[%c0_91, %c0_92], %94 {strides = array<i32>} : memref<16x32xf32, #tpu.memory_space<vmem>>, vector<2x32xf32>,
    %c0_93 = arith.constant 0 : index
    %c0_94 = arith.constant 0 : index
    %97 = vector.load %arg18[%c0_93, %c0_94] : memref<16x32xf32, #tpu.memory_space<vmem>>, vector<16x32xf32>
    %c0_95 = arith.constant 0 : index
    %c0_96 = arith.constant 0 : index
    %98 = vector.load %arg19[%c0_95, %c0_96] : memref<16x32xf32, #tpu.memory_space<vmem>>, vector<16x32xf32>
    %c0_97 = arith.constant 0 : index
    %c0_98 = arith.constant 0 : index
    %99 = vector.load %arg7[%c0_97, %c0_98] : memref<64x32xf32, #tpu.memory_space<vmem>>, vector<32x32xf32>
    %cst_99 = arith.constant dense<0.000000e+00> : vector<16x32xf32>
    %100 = tpu.matmul %97, %99, %cst_99 {dimension_numbers = #tpu.dot_dimension_numbers<[1], [0], [0], [1], [0, 0, 1, 1], [], []>} : vector<16x32xf32>, vector<32x32xf32>, vector<16x32xf32> -> vector<16x32xf32>
    %c32 = arith.constant 32 : index
    %c0_100 = arith.constant 0 : index
    %101 = vector.load %arg7[%c32, %c0_100] : memref<64x32xf32, #tpu.memory_space<vmem>>, vector<32x32xf32>
    %cst_101 = arith.constant dense<0.000000e+00> : vector<16x32xf32>
    %102 = tpu.matmul %98, %101, %cst_101 {dimension_numbers = #tpu.dot_dimension_numbers<[1], [0], [0], [1], [0, 0, 1, 1], [], []>} : vector<16x32xf32>, vector<32x32xf32>, vector<16x32xf32> -> vector<16x32xf32>
    %103 = arith.addf %100, %102 : vector<16x32xf32>
    %c0_102 = arith.constant 0 : index
    %c0_103 = arith.constant 0 : index
    %104 = vector.load %arg9[%c0_102, %c0_103] : memref<1x32xf32, #tpu.memory_space<vmem>>, vector<1x32xf32>
    %105 = vector.broadcast %104 : vector<1x32xf32> to vector<16x32xf32>
    %106 = arith.addf %103, %105 : vector<16x32xf32>
    %c0_104 = arith.constant 0 : index
    %c0_105 = arith.constant 0 : index
    %107 = vector.load %arg16[%c0_104, %c0_105] : memref<16x32xf32, #tpu.memory_space<vmem>>, vector<16x32xf32>
    tpu.vector_store %arg16[%c0_104, %c0_105], %106 {strides = array<i32>} : memref<16x32xf32, #tpu.memory_space<vmem>>, vector<16x32xf32>,
    %c0_106 = arith.constant 0 : index
    %c0_107 = arith.constant 0 : index
    %108 = vector.load %arg10[%c0_106, %c0_107] : memref<64x32xf32, #tpu.memory_space<vmem>>, vector<32x32xf32>
    %cst_108 = arith.constant dense<0.000000e+00> : vector<16x32xf32>
    %109 = tpu.matmul %97, %108, %cst_108 {dimension_numbers = #tpu.dot_dimension_numbers<[1], [0], [0], [1], [0, 0, 1, 1], [], []>} : vector<16x32xf32>, vector<32x32xf32>, vector<16x32xf32> -> vector<16x32xf32>
    %c32_109 = arith.constant 32 : index
    %c0_110 = arith.constant 0 : index
    %110 = vector.load %arg10[%c32_109, %c0_110] : memref<64x32xf32, #tpu.memory_space<vmem>>, vector<32x32xf32>
    %cst_111 = arith.constant dense<0.000000e+00> : vector<16x32xf32>
    %111 = tpu.matmul %98, %110, %cst_111 {dimension_numbers = #tpu.dot_dimension_numbers<[1], [0], [0], [1], [0, 0, 1, 1], [], []>} : vector<16x32xf32>, vector<32x32xf32>, vector<16x32xf32> -> vector<16x32xf32>
    %112 = arith.addf %109, %111 : vector<16x32xf32>
    %c0_112 = arith.constant 0 : index
    %c0_113 = arith.constant 0 : index
    %113 = vector.load %arg12[%c0_112, %c0_113] : memref<1x32xf32, #tpu.memory_space<vmem>>, vector<1x32xf32>
    %114 = vector.broadcast %113 : vector<1x32xf32> to vector<16x32xf32>
    %115 = arith.addf %112, %114 : vector<16x32xf32>
    %c0_114 = arith.constant 0 : index
    %c0_115 = arith.constant 0 : index
    %116 = vector.load %arg17[%c0_114, %c0_115] : memref<16x32xf32, #tpu.memory_space<vmem>>, vector<16x32xf32>
    tpu.vector_store %arg17[%c0_114, %c0_115], %115 {strides = array<i32>} : memref<16x32xf32, #tpu.memory_space<vmem>>, vector<16x32xf32>,
    %c0_116 = arith.constant 0 : index
    %c0_117 = arith.constant 0 : index
    %117 = vector.load %arg8[%c0_116, %c0_117] : memref<32x32xf32, #tpu.memory_space<vmem>>, vector<32x32xf32>
    %c0_118 = arith.constant 0 : index
    %c0_119 = arith.constant 0 : index
    %118 = vector.load %arg11[%c0_118, %c0_119] : memref<32x32xf32, #tpu.memory_space<vmem>>, vector<32x32xf32>
    %cst_120 = arith.constant 0.000000e+00 : f32
    %119 = vector.broadcast %cst_120 : f32 to vector<2x32xf32>
    %cst_121 = arith.constant 0.000000e+00 : f32
    %120 = vector.broadcast %cst_121 : f32 to vector<2x32xf32>
    %c0_122 = arith.constant 0 : index
    %c0_123 = arith.constant 0 : index
    %121 = vector.load %arg16[%c0_122, %c0_123] : memref<16x32xf32, #tpu.memory_space<vmem>>, vector<2x32xf32>
    %cst_124 = arith.constant dense<0.000000e+00> : vector<2x32xf32>
    %122 = tpu.matmul %119, %117, %cst_124 {dimension_numbers = #tpu.dot_dimension_numbers<[1], [0], [0], [1], [0, 0, 1, 1], [], []>} : vector<2x32xf32>, vector<32x32xf32>, vector<2x32xf32> -> vector<2x32xf32>
    %123 = arith.addf %121, %122 : vector<2x32xf32>
    %124 = math.tanh %123 : vector<2x32xf32>
    %c14_125 = arith.constant 14 : index
    %c0_126 = arith.constant 0 : index
    %125 = vector.load %arg17[%c14_125, %c0_126] : memref<16x32xf32, #tpu.memory_space<vmem>>, vector<2x32xf32>
    %cst_127 = arith.constant dense<0.000000e+00> : vector<2x32xf32>
    %126 = tpu.matmul %120, %118, %cst_127 {dimension_numbers = #tpu.dot_dimension_numbers<[1], [0], [0], [1], [0, 0, 1, 1], [], []>} : vector<2x32xf32>, vector<32x32xf32>, vector<2x32xf32> -> vector<2x32xf32>
    %127 = arith.addf %125, %126 : vector<2x32xf32>
    %128 = math.tanh %127 : vector<2x32xf32>
    %c2_128 = arith.constant 2 : index
    %c0_129 = arith.constant 0 : index
    %129 = vector.load %arg16[%c2_128, %c0_129] : memref<16x32xf32, #tpu.memory_space<vmem>>, vector<2x32xf32>
    %cst_130 = arith.constant dense<0.000000e+00> : vector<2x32xf32>
    %130 = tpu.matmul %124, %117, %cst_130 {dimension_numbers = #tpu.dot_dimension_numbers<[1], [0], [0], [1], [0, 0, 1, 1], [], []>} : vector<2x32xf32>, vector<32x32xf32>, vector<2x32xf32> -> vector<2x32xf32>
    %131 = arith.addf %129, %130 : vector<2x32xf32>
    %132 = math.tanh %131 : vector<2x32xf32>
    %c12_131 = arith.constant 12 : index
    %c0_132 = arith.constant 0 : index
    %133 = vector.load %arg17[%c12_131, %c0_132] : memref<16x32xf32, #tpu.memory_space<vmem>>, vector<2x32xf32>
    %cst_133 = arith.constant dense<0.000000e+00> : vector<2x32xf32>
    %134 = tpu.matmul %128, %118, %cst_133 {dimension_numbers = #tpu.dot_dimension_numbers<[1], [0], [0], [1], [0, 0, 1, 1], [], []>} : vector<2x32xf32>, vector<32x32xf32>, vector<2x32xf32> -> vector<2x32xf32>
    %135 = arith.addf %133, %134 : vector<2x32xf32>
    %136 = math.tanh %135 : vector<2x32xf32>
    %c4_134 = arith.constant 4 : index
    %c0_135 = arith.constant 0 : index
    %137 = vector.load %arg16[%c4_134, %c0_135] : memref<16x32xf32, #tpu.memory_space<vmem>>, vector<2x32xf32>
    %cst_136 = arith.constant dense<0.000000e+00> : vector<2x32xf32>
    %138 = tpu.matmul %132, %117, %cst_136 {dimension_numbers = #tpu.dot_dimension_numbers<[1], [0], [0], [1], [0, 0, 1, 1], [], []>} : vector<2x32xf32>, vector<32x32xf32>, vector<2x32xf32> -> vector<2x32xf32>
    %139 = arith.addf %137, %138 : vector<2x32xf32>
    %140 = math.tanh %139 : vector<2x32xf32>
    %c10_137 = arith.constant 10 : index
    %c0_138 = arith.constant 0 : index
    %141 = vector.load %arg17[%c10_137, %c0_138] : memref<16x32xf32, #tpu.memory_space<vmem>>, vector<2x32xf32>
    %cst_139 = arith.constant dense<0.000000e+00> : vector<2x32xf32>
    %142 = tpu.matmul %136, %118, %cst_139 {dimension_numbers = #tpu.dot_dimension_numbers<[1], [0], [0], [1], [0, 0, 1, 1], [], []>} : vector<2x32xf32>, vector<32x32xf32>, vector<2x32xf32> -> vector<2x32xf32>
    %143 = arith.addf %141, %142 : vector<2x32xf32>
    %144 = math.tanh %143 : vector<2x32xf32>
    %c6_140 = arith.constant 6 : index
    %c0_141 = arith.constant 0 : index
    %145 = vector.load %arg16[%c6_140, %c0_141] : memref<16x32xf32, #tpu.memory_space<vmem>>, vector<2x32xf32>
    %cst_142 = arith.constant dense<0.000000e+00> : vector<2x32xf32>
    %146 = tpu.matmul %140, %117, %cst_142 {dimension_numbers = #tpu.dot_dimension_numbers<[1], [0], [0], [1], [0, 0, 1, 1], [], []>} : vector<2x32xf32>, vector<32x32xf32>, vector<2x32xf32> -> vector<2x32xf32>
    %147 = arith.addf %145, %146 : vector<2x32xf32>
    %148 = math.tanh %147 : vector<2x32xf32>
    %c8_143 = arith.constant 8 : index
    %c0_144 = arith.constant 0 : index
    %149 = vector.load %arg17[%c8_143, %c0_144] : memref<16x32xf32, #tpu.memory_space<vmem>>, vector<2x32xf32>
    %cst_145 = arith.constant dense<0.000000e+00> : vector<2x32xf32>
    %150 = tpu.matmul %144, %118, %cst_145 {dimension_numbers = #tpu.dot_dimension_numbers<[1], [0], [0], [1], [0, 0, 1, 1], [], []>} : vector<2x32xf32>, vector<32x32xf32>, vector<2x32xf32> -> vector<2x32xf32>
    %151 = arith.addf %149, %150 : vector<2x32xf32>
    %152 = math.tanh %151 : vector<2x32xf32>
    %c8_146 = arith.constant 8 : index
    %c0_147 = arith.constant 0 : index
    %153 = vector.load %arg16[%c8_146, %c0_147] : memref<16x32xf32, #tpu.memory_space<vmem>>, vector<2x32xf32>
    %cst_148 = arith.constant dense<0.000000e+00> : vector<2x32xf32>
    %154 = tpu.matmul %148, %117, %cst_148 {dimension_numbers = #tpu.dot_dimension_numbers<[1], [0], [0], [1], [0, 0, 1, 1], [], []>} : vector<2x32xf32>, vector<32x32xf32>, vector<2x32xf32> -> vector<2x32xf32>
    %155 = arith.addf %153, %154 : vector<2x32xf32>
    %156 = math.tanh %155 : vector<2x32xf32>
    %c6_149 = arith.constant 6 : index
    %c0_150 = arith.constant 0 : index
    %157 = vector.load %arg17[%c6_149, %c0_150] : memref<16x32xf32, #tpu.memory_space<vmem>>, vector<2x32xf32>
    %cst_151 = arith.constant dense<0.000000e+00> : vector<2x32xf32>
    %158 = tpu.matmul %152, %118, %cst_151 {dimension_numbers = #tpu.dot_dimension_numbers<[1], [0], [0], [1], [0, 0, 1, 1], [], []>} : vector<2x32xf32>, vector<32x32xf32>, vector<2x32xf32> -> vector<2x32xf32>
    %159 = arith.addf %157, %158 : vector<2x32xf32>
    %160 = math.tanh %159 : vector<2x32xf32>
    %c10_152 = arith.constant 10 : index
    %c0_153 = arith.constant 0 : index
    %161 = vector.load %arg16[%c10_152, %c0_153] : memref<16x32xf32, #tpu.memory_space<vmem>>, vector<2x32xf32>
    %cst_154 = arith.constant dense<0.000000e+00> : vector<2x32xf32>
    %162 = tpu.matmul %156, %117, %cst_154 {dimension_numbers = #tpu.dot_dimension_numbers<[1], [0], [0], [1], [0, 0, 1, 1], [], []>} : vector<2x32xf32>, vector<32x32xf32>, vector<2x32xf32> -> vector<2x32xf32>
    %163 = arith.addf %161, %162 : vector<2x32xf32>
    %164 = math.tanh %163 : vector<2x32xf32>
    %c4_155 = arith.constant 4 : index
    %c0_156 = arith.constant 0 : index
    %165 = vector.load %arg17[%c4_155, %c0_156] : memref<16x32xf32, #tpu.memory_space<vmem>>, vector<2x32xf32>
    %cst_157 = arith.constant dense<0.000000e+00> : vector<2x32xf32>
    %166 = tpu.matmul %160, %118, %cst_157 {dimension_numbers = #tpu.dot_dimension_numbers<[1], [0], [0], [1], [0, 0, 1, 1], [], []>} : vector<2x32xf32>, vector<32x32xf32>, vector<2x32xf32> -> vector<2x32xf32>
    %167 = arith.addf %165, %166 : vector<2x32xf32>
    %168 = math.tanh %167 : vector<2x32xf32>
    %c12_158 = arith.constant 12 : index
    %c0_159 = arith.constant 0 : index
    %169 = vector.load %arg16[%c12_158, %c0_159] : memref<16x32xf32, #tpu.memory_space<vmem>>, vector<2x32xf32>
    %cst_160 = arith.constant dense<0.000000e+00> : vector<2x32xf32>
    %170 = tpu.matmul %164, %117, %cst_160 {dimension_numbers = #tpu.dot_dimension_numbers<[1], [0], [0], [1], [0, 0, 1, 1], [], []>} : vector<2x32xf32>, vector<32x32xf32>, vector<2x32xf32> -> vector<2x32xf32>
    %171 = arith.addf %169, %170 : vector<2x32xf32>
    %172 = math.tanh %171 : vector<2x32xf32>
    %c2_161 = arith.constant 2 : index
    %c0_162 = arith.constant 0 : index
    %173 = vector.load %arg17[%c2_161, %c0_162] : memref<16x32xf32, #tpu.memory_space<vmem>>, vector<2x32xf32>
    %cst_163 = arith.constant dense<0.000000e+00> : vector<2x32xf32>
    %174 = tpu.matmul %168, %118, %cst_163 {dimension_numbers = #tpu.dot_dimension_numbers<[1], [0], [0], [1], [0, 0, 1, 1], [], []>} : vector<2x32xf32>, vector<32x32xf32>, vector<2x32xf32> -> vector<2x32xf32>
    %175 = arith.addf %173, %174 : vector<2x32xf32>
    %176 = math.tanh %175 : vector<2x32xf32>
    %c14_164 = arith.constant 14 : index
    %c0_165 = arith.constant 0 : index
    %177 = vector.load %arg16[%c14_164, %c0_165] : memref<16x32xf32, #tpu.memory_space<vmem>>, vector<2x32xf32>
    %cst_166 = arith.constant dense<0.000000e+00> : vector<2x32xf32>
    %178 = tpu.matmul %172, %117, %cst_166 {dimension_numbers = #tpu.dot_dimension_numbers<[1], [0], [0], [1], [0, 0, 1, 1], [], []>} : vector<2x32xf32>, vector<32x32xf32>, vector<2x32xf32> -> vector<2x32xf32>
    %179 = arith.addf %177, %178 : vector<2x32xf32>
    %180 = math.tanh %179 : vector<2x32xf32>
    %c0_167 = arith.constant 0 : index
    %c0_168 = arith.constant 0 : index
    %181 = vector.load %arg17[%c0_167, %c0_168] : memref<16x32xf32, #tpu.memory_space<vmem>>, vector<2x32xf32>
    %cst_169 = arith.constant dense<0.000000e+00> : vector<2x32xf32>
    %182 = tpu.matmul %176, %118, %cst_169 {dimension_numbers = #tpu.dot_dimension_numbers<[1], [0], [0], [1], [0, 0, 1, 1], [], []>} : vector<2x32xf32>, vector<32x32xf32>, vector<2x32xf32> -> vector<2x32xf32>
    %183 = arith.addf %181, %182 : vector<2x32xf32>
    %184 = math.tanh %183 : vector<2x32xf32>
    %cst_170 = arith.constant 0.000000e+00 : f32
    %185 = vector.broadcast %cst_170 : f32 to vector<2x2xf32>
    %c0_171 = arith.constant 0 : index
    %c0_172 = arith.constant 0 : index
    %186 = vector.load %arg14[%c0_171, %c0_172] : memref<1x2xf32, #tpu.memory_space<vmem>>, vector<1x2xf32>
    %187 = vector.broadcast %186 : vector<1x2xf32> to vector<2x2xf32>
    %188 = arith.addf %185, %187 : vector<2x2xf32>
    %c0_173 = arith.constant 0 : index
    %c0_174 = arith.constant 0 : index
    %189 = vector.load %arg13[%c0_173, %c0_174] : memref<128x2xf32, #tpu.memory_space<vmem>>, vector<32x2xf32>
    %cst_175 = arith.constant dense<0.000000e+00> : vector<2x2xf32>
    %190 = tpu.matmul %90, %189, %cst_175 {dimension_numbers = #tpu.dot_dimension_numbers<[1], [0], [0], [1], [0, 0, 1, 1], [], []>} : vector<2x32xf32>, vector<32x2xf32>, vector<2x2xf32> -> vector<2x2xf32>
    %191 = arith.addf %188, %190 : vector<2x2xf32>
    %c32_176 = arith.constant 32 : index
    %c0_177 = arith.constant 0 : index
    %192 = vector.load %arg13[%c32_176, %c0_177] : memref<128x2xf32, #tpu.memory_space<vmem>>, vector<32x2xf32>
    %cst_178 = arith.constant dense<0.000000e+00> : vector<2x2xf32>
    %193 = tpu.matmul %94, %192, %cst_178 {dimension_numbers = #tpu.dot_dimension_numbers<[1], [0], [0], [1], [0, 0, 1, 1], [], []>} : vector<2x32xf32>, vector<32x2xf32>, vector<2x2xf32> -> vector<2x2xf32>
    %194 = arith.addf %191, %193 : vector<2x2xf32>
    %c64 = arith.constant 64 : index
    %c0_179 = arith.constant 0 : index
    %195 = vector.load %arg13[%c64, %c0_179] : memref<128x2xf32, #tpu.memory_space<vmem>>, vector<32x2xf32>
    %cst_180 = arith.constant dense<0.000000e+00> : vector<2x2xf32>
    %196 = tpu.matmul %180, %195, %cst_180 {dimension_numbers = #tpu.dot_dimension_numbers<[1], [0], [0], [1], [0, 0, 1, 1], [], []>} : vector<2x32xf32>, vector<32x2xf32>, vector<2x2xf32> -> vector<2x2xf32>
    %197 = arith.addf %194, %196 : vector<2x2xf32>
    %c96 = arith.constant 96 : index
    %c0_181 = arith.constant 0 : index
    %198 = vector.load %arg13[%c96, %c0_181] : memref<128x2xf32, #tpu.memory_space<vmem>>, vector<32x2xf32>
    %cst_182 = arith.constant dense<0.000000e+00> : vector<2x2xf32>
    %199 = tpu.matmul %184, %198, %cst_182 {dimension_numbers = #tpu.dot_dimension_numbers<[1], [0], [0], [1], [0, 0, 1, 1], [], []>} : vector<2x32xf32>, vector<32x2xf32>, vector<2x2xf32> -> vector<2x2xf32>
    %200 = arith.addf %197, %199 : vector<2x2xf32>
    %c0_183 = arith.constant 0 : index
    %c0_184 = arith.constant 0 : index
    %201 = vector.load %arg15[%c0_183, %c0_184] : memref<2x2xf32, #tpu.memory_space<vmem>>, vector<2x2xf32>
    tpu.vector_store %arg15[%c0_183, %c0_184], %200 {strides = array<i32>} : memref<2x2xf32, #tpu.memory_space<vmem>>, vector<2x2xf32>,
    return
  }
}

</mosaic_0001>

<bundles_post_ra>
// kernel: tc_base_forward.1
= control target key start
LH: loop header
LB: loop body
LE: loop exit
PB: predicated region body
PF: predicated region fallthrough
CT: control target
= control target key end

     0   :  { %vm59_vm0 = vcmask 130048   ;;  %s1897_s0 = inlined_call_operand.vmem [shape: f32[16,16], index: 0, kind: input, shape index: {}]   ;;  %s1898_s1 = inlined_call_operand.vmem [shape: f32[16,32], index: 1, kind: input, shape index: {}]   ;;  %s1899_s2 = inlined_call_operand.vmem [shape: f32[32,32], index: 2, kind: input, shape index: {}]   ;;  %s1900_s3 = inlined_call_operand.vmem [shape: f32[1,32], index: 3, kind: input, shape index: {}]   ;;  %s1901_s4 = inlined_call_operand.vmem [shape: f32[16,32], index: 4, kind: input, shape index: {}]   ;;  %s1902_s5 = inlined_call_operand.vmem [shape: f32[32,32], index: 5, kind: input, shape index: {}]   ;;  %s1903_s6 = inlined_call_operand.vmem [shape: f32[1,32], index: 6, kind: input, shape index: {}]   ;;  %s1904_s7 = inlined_call_operand.vmem [shape: f32[64,32], index: 7, kind: input, shape index: {}]   ;;  %s1905_s8 = inlined_call_operand.vmem [shape: f32[32,32], index: 8, kind: input, shape index: {}]   ;;  %s1906_s9 = inlined_call_operand.vmem [shape: f32[1,32], index: 9, kind: input, shape index: {}]   ;;  %s1907_s10 = inlined_call_operand.vmem [shape: f32[64,32], index: 10, kind: input, shape index: {}]   ;;  %s1908_s11 = inlined_call_operand.vmem [shape: f32[32,32], index: 11, kind: input, shape index: {}]   ;;  %s1909_s12 = inlined_call_operand.vmem [shape: f32[1,32], index: 12, kind: input, shape index: {}]   ;;  %s1910_s13 = inlined_call_operand.vmem [shape: f32[128,2], index: 13, kind: input, shape index: {}]   ;;  %s1911_s14 = inlined_call_operand.vmem [shape: f32[1,2], index: 14, kind: input, shape index: {}]   ;;  %s1912_s15 = inlined_call_operand.hbm [shape: f32[2,2], index: 15, kind: output, shape index: {}]  }
   0x1   :  { %v54_v0 = vld [vmem:[%s1898_s1 + $0x8] sm:$0xff]  ;;  %v1486_v2 = vld [vmem:[%s1899_s2 + $0x18] sm:$0xff]  ;;  %v53_v3 = vld [vmem:[%s1898_s1] sm:$0xff] }
   0x2   :  { %v93_v1 = vld [vmem:[%s1901_s4 + $0x8] sm:$0xff]  ;;  %80 = vmatpush.msra.mxu0 %v54_v0  ;;  %v92_v4 = vld [vmem:[%s1901_s4] sm:$0xff]  ;;  %v1497_v5 = vld [vmem:[%s1899_s2 + $0x10] sm:$0xff]  ;;  %147 = vmatpush.msra.mxu2 %v1486_v2 }
   0x3   :  { %112 = vmatpush.msra.mxu1 %v93_v1  ;;  %v51_v6 = vld [vmem:[%s1897_s0] sm:$0xff]  ;;  %v1506_v7 = vld [vmem:[%s1899_s2 + $0x8] sm:$0xff]  ;;  %v1511_v8 = vld [vmem:[%s1902_s5 + $0x18] sm:$0xff] }
   0x4   :  { %81 = vmatpush.msra.mxu0 %v53_v3  ;;  %148 = vmatpush.msra.mxu2 %v1497_v5  ;;  %v1518_v9 = vld [vmem:[%s1899_s2] sm:$0xff]  ;;  %v1523_v10 = vld [vmem:[%s1902_s5 + $0x10] sm:$0xff]  ;;  %v1530_v11 = vld [vmem:[%s1902_s5 + $0x8] sm:$0xff] }
   0x5   :  { %113 = vmatpush.msra.mxu1 %v92_v4  ;;  %1254 = vmatmul.msk.f32.vlgmr.msra.gmra.mxu0 %vm59_vm0, %v51_v6 }
   0x6   :  { %1256 = vmatmul.msk.f32.vlgmr.msra.gmra.mxu1 %vm59_vm0, %v51_v6  ;;  %170 = vmatpush.msra.mxu3 %v1511_v8 }
   0x7   :  { %149 = vmatpush.msra.mxu2 %v1506_v7  ;;  %279 = vmatpush.msrb.mxu1 %v1511_v8 }
   0x8   :  { %20 = vsyncpa [#allocation7], 0  ;;  %171 = vmatpush.msra.mxu3 %v1523_v10  ;;  %253 = vmatpush.msrb.mxu0 %v1486_v2  ;;  %v1540_v12 = vld [vmem:[%s1902_s5] sm:$0xff]  ;;  %v1395_v13 = vmov 0.0   ;;  %v52_v14 = vld [vmem:[%s1897_s0 + $0x8] sm:$0xff]  ;;  %vm89_vm1 = vcmask 261120  }
   0x9   :  { %150 = vmatpush.msra.mxu2 %v1518_v9  ;;  %280 = vmatpush.msrb.mxu1 %v1523_v10  ;;  %v1300_v15 = vld [vmem:[%s1900_s3] ss:$0 sm:$0xff]  ;;  %vm180_vm2 = vcmask 254976   ;;  %v568_v1 = vld [vmem:[%s1904_s7 + $0x18] sm:$0xff]  ;;  %v566_v3 = vld [vmem:[%s1904_s7 + $0x8] sm:$0xff]  ;;  %s1245_s22 = sshll.u32 %s1912_s15, 4  ;;  %s1246_s22 = int_to_ptr.hbm [resolvable:$true] %s1245_s22 }
   0xa   :  { %151 = vmatmul.f32.vlgmr.msra.gmra.mxu2 %v1395_v13  ;;  %172 = vmatpush.msra.mxu3 %v1530_v11  ;;  %v1301_v16 = vld [vmem:[%s1903_s6] ss:$0 sm:$0xff]  ;;  %vm1236_vm3 = vcmask 9216  }
   0xb   :  { %199 = vmatpush.msrb.mxu2 %v1486_v2  ;;  %254 = vmatpush.msrb.mxu0 %v1497_v5  ;;  %v565_v4 = vld [vmem:[%s1904_s7] sm:$0xff] }
   0xc   :  { %173 = vmatpush.msra.mxu3 %v1540_v12  ;;  %281 = vmatpush.msrb.mxu1 %v1530_v11 }
   0xd   :  { %174 = vmatmul.f32.vlgmr.msra.gmra.mxu3 %v1395_v13  ;;  %200 = vmatpush.msrb.mxu2 %v1497_v5 }
   0xe   :  { %1257 = vmatmul.msk.f32.gmra.mxu1 %vm59_vm0, %v52_v14  ;;  %225 = vmatpush.msrb.mxu3 %v1511_v8 }
   0xf   :  { %201 = vmatpush.msrb.mxu2 %v1506_v7  ;;  %1255 = vmatmul.msk.f32.gmra.mxu0 %vm59_vm0, %v52_v14 }
  0x10   :  { %226 = vmatpush.msrb.mxu3 %v1523_v10  ;;  %255 = vmatpush.msrb.mxu0 %v1506_v7 }
  0x11   :  { %202 = vmatpush.msrb.mxu2 %v1518_v9  ;;  %282 = vmatpush.msrb.mxu1 %v1540_v12 }
  0x12   :  { %227 = vmatpush.msrb.mxu3 %v1530_v11  ;;  %256 = vmatpush.msrb.mxu0 %v1518_v9 }
  0x13   :  { %307 = vmatpush.msra.mxu2 %v1486_v2  ;;  %387 = vmatpush.msra.mxu1 %v1511_v8 }
  0x14   :  { %361 = vmatpush.msra.mxu0 %v1486_v2  ;;  %228 = vmatpush.msrb.mxu3 %v1540_v12 }
  0x15   :  { %308 = vmatpush.msra.mxu2 %v1497_v5  ;;  %388 = vmatpush.msra.mxu1 %v1523_v10 }
  0x16   :  { %333 = vmatpush.msra.mxu3 %v1511_v8  ;;  %362 = vmatpush.msra.mxu0 %v1497_v5 }
  0x17   :  { %309 = vmatpush.msra.mxu2 %v1506_v7  ;;  %389 = vmatpush.msra.mxu1 %v1530_v11 }
  0x18   :  { %334 = vmatpush.msra.mxu3 %v1523_v10  ;;  %363 = vmatpush.msra.mxu0 %v1506_v7 }
  0x19   :  { %310 = vmatpush.msra.mxu2 %v1518_v9  ;;  %390 = vmatpush.msra.mxu1 %v1540_v12 }
  0x1a   :  { %335 = vmatpush.msra.mxu3 %v1530_v11  ;;  %364 = vmatpush.msra.mxu0 %v1518_v9 }
  0x1c   :  { %336 = vmatpush.msra.mxu3 %v1540_v12 }
  0x82   :  { %v83_v17 = vpop.f32.mrf.mxu0 }
  0x83   :  { %v84_v18 = vadd.f32 %v1300_v15, %v83_v17  ;;  %v115_v19 = vpop.f32.mrf.mxu1  ;;  %v640_v17 = vld [vmem:[%s1907_s10 + $0x8] sm:$0xff] }
  0x84   :  { %v116_v20 = vadd.f32 %v1301_v16, %v115_v19 }
  0x85   :  { %90 = vst.msk [vmem:[#allocation2] sm:$0xff] %vm89_vm1, %v84_v18  ;;  %v639_v18 = vld [vmem:[%s1907_s10] sm:$0xff] }
  0x86   :  { %121 = vst.msk [vmem:[#allocation3] sm:$0xff] %vm89_vm1, %v116_v20 }
  0x8b   :  { %v118_v21 = vpop.f32.mrf.mxu1 }
  0x8c   :  { %v119_v22 = vadd.f32 %v1301_v16, %v118_v21  ;;  %v131_v23 = vld [vmem:[#allocation2] sm:$0x3]  ;;  %v86_v31 = vpop.f32.mrf.mxu0  ;;  %v183_v33 = vld [vmem:[#allocation2 + $0x2] sm:$0x3]  ;;  %v237_v41 = vld [vmem:[#allocation2 + $0x4] sm:$0x3] }
  0x8d   :  { %v152_v24 = vpop.f32.mrf.mxu2  ;;  %v87_v32 = vadd.f32 %v1300_v15, %v86_v31  ;;  %v291_v49 = vld [vmem:[#allocation2 + $0x6] sm:$0x3]  ;;  %v371_v60 = vld [vmem:[#allocation3 + $0x6] sm:$0x3]  ;;  %v642_v15 = vld [vmem:[%s1907_s10 + $0x18] sm:$0xff] }
  0x8e   :  { %122 = vst.msk [vmem:[#allocation3 + $0x8] sm:$0xff] %vm89_vm1, %v119_v22  ;;  %v155_v25 = vadd.f32 %v152_v24, %v131_v23  ;;  %v641_v16 = vld [vmem:[%s1907_s10 + $0x10] sm:$0xff]  ;;  %v644_v31 = vld [vmem:[%s1907_s10 + $0x28] sm:$0xff] }
  0x8f   :  { %91 = vst.msk [vmem:[#allocation2 + $0x8] sm:$0xff] %vm89_vm1, %v87_v32  ;;  %v479_v22 = vld [vmem:[#allocation3 + $0x2] sm:$0x3]  ;;  %v570_v32 = vld [vmem:[%s1904_s7 + $0x28] sm:$0xff] }
  0x90   :  { %1305 = vtanh.f32 %v155_v25  ;;  %v175_v26 = vpop.f32.mrf.mxu3 }
  0x95   :  { %v157_v27 = vld [vmem:[#allocation3 + $0xe] sm:$0x3]  ;;  %v209_v36 = vld [vmem:[#allocation3 + $0xc] sm:$0x3]  ;;  %v263_v44 = vld [vmem:[#allocation3 + $0xa] sm:$0x3] }
  0x96   :  { %v1306_v28 = vpop.eup %1305  ;;  %v178_v29 = vadd.f32 %v175_v26, %v157_v27  ;;  %v317_v52 = vld [vmem:[#allocation3 + $0x8] sm:$0x3]  ;;  %v345_v57 = vld [vmem:[#allocation2 + $0x8] sm:$0x3]  ;;  %v453_v19 = vld [vmem:[#allocation2 + $0xc] sm:$0x3] }
  0x97   :  { %181 = vst.msk [vmem:[#allocation4] sm:$0x3] %vm180_vm2, %v1306_v28  ;;  %1258 = vmatmul.msk.f32.vlgmr.msrb.gmra.mxu2 %vm89_vm1, %v1306_v28  ;;  %v646_v27 = vld [vmem:[%s1907_s10 + $0x38] sm:$0xff] }
  0x98   :  { %1307 = vtanh.f32 %v178_v29  ;;  %415 = vmatpush.msrb.mxu2 %v1486_v2  ;;  %v572_v28 = vld [vmem:[%s1904_s7 + $0x38] sm:$0xff]  ;;  %v645_v29 = vld [vmem:[%s1907_s10 + $0x30] sm:$0xff] }
  0x9a   :  { %416 = vmatpush.msrb.mxu2 %v1497_v5 }
  0x9c   :  { %417 = vmatpush.msrb.mxu2 %v1506_v7 }
  0x9e   :  { %v1308_v30 = vpop.eup %1307  ;;  %418 = vmatpush.msrb.mxu2 %v1518_v9 }
  0x9f   :  { %182 = vst.msk [vmem:[#allocation5 + $0xe] sm:$0x3] %vm180_vm2, %v1308_v30  ;;  %1259 = vmatmul.msk.f32.vlgmr.msrb.gmra.mxu3 %vm89_vm1, %v1308_v30  ;;  %v571_v30 = vld [vmem:[%s1904_s7 + $0x30] sm:$0xff] }
  0xa0   :  { %441 = vmatpush.msrb.mxu3 %v1511_v8 }
  0xa2   :  { %442 = vmatpush.msrb.mxu3 %v1523_v10 }
  0xa4   :  { %443 = vmatpush.msrb.mxu3 %v1530_v11 }
  0xa6   :  { %444 = vmatpush.msrb.mxu3 %v1540_v12 }
 0x11a   :  { %v204_v34 = vpop.f32.mrf.mxu2 }
 0x11b   :  { %v207_v35 = vadd.f32 %v204_v34, %v183_v33  ;;  %v643_v33 = vld [vmem:[%s1907_s10 + $0x20] sm:$0xff] }
 0x11c   :  { %v569_v34 = vld [vmem:[%s1904_s7 + $0x20] sm:$0xff] }
 0x11d   :  { %1309 = vtanh.f32 %v207_v35  ;;  %v507_v35 = vld [vmem:[#allocation2 + $0xe] sm:$0x3] }
 0x122   :  { %v230_v37 = vpop.f32.mrf.mxu3 }
 0x123   :  { %v1310_v38 = vpop.eup %1309  ;;  %v233_v39 = vadd.f32 %v230_v37, %v209_v36 }
 0x124   :  { %235 = vst.msk [vmem:[#allocation4 + $0x2] sm:$0x3] %vm180_vm2, %v1310_v38  ;;  %1260 = vmatmul.msk.f32.vlgmr.msrb.gmra.mxu0 %vm89_vm1, %v1310_v38  ;;  %v1696_v38 = vld [vmem:[%s1905_s8 + $0x18] sm:$0xff] }
 0x125   :  { %1311 = vtanh.f32 %v233_v39  ;;  %469 = vmatpush.msrb.mxu0 %v1486_v2  ;;  %v1701_v39 = vld [vmem:[%s1908_s11 + $0x18] sm:$0xff] }
 0x127   :  { %470 = vmatpush.msrb.mxu0 %v1497_v5 }
 0x129   :  { %471 = vmatpush.msrb.mxu0 %v1506_v7 }
 0x12b   :  { %v1312_v40 = vpop.eup %1311  ;;  %472 = vmatpush.msrb.mxu0 %v1518_v9 }
 0x12c   :  { %236 = vst.msk [vmem:[#allocation5 + $0xc] sm:$0x3] %vm180_vm2, %v1312_v40  ;;  %1261 = vmatmul.msk.f32.vlgmr.msrb.gmra.mxu1 %vm89_vm1, %v1312_v40  ;;  %v1706_v40 = vld [vmem:[%s1905_s8 + $0x10] sm:$0xff] }
 0x12d   :  { %495 = vmatpush.msrb.mxu1 %v1511_v8 }
 0x12f   :  { %496 = vmatpush.msrb.mxu1 %v1523_v10 }
 0x131   :  { %497 = vmatpush.msrb.mxu1 %v1530_v11 }
 0x133   :  { %498 = vmatpush.msrb.mxu1 %v1540_v12 }
 0x1a1   :  { %v258_v42 = vpop.f32.mrf.mxu0 }
 0x1a2   :  { %v261_v43 = vadd.f32 %v258_v42, %v237_v41  ;;  %v1713_v41 = vld [vmem:[%s1908_s11 + $0x10] sm:$0xff]  ;;  %v1718_v42 = vld [vmem:[%s1905_s8 + $0x8] sm:$0xff] }
 0x1a4   :  { %1313 = vtanh.f32 %v261_v43  ;;  %v1727_v43 = vld [vmem:[%s1905_s8] sm:$0xff] }
 0x1a9   :  { %v284_v45 = vpop.f32.mrf.mxu1 }
 0x1aa   :  { %v1314_v46 = vpop.eup %1313  ;;  %v287_v47 = vadd.f32 %v284_v45, %v263_v44  ;;  %v533_v44 = vld [vmem:[#allocation3] sm:$0x3] }
 0x1ab   :  { %289 = vst.msk [vmem:[#allocation4 + $0x4] sm:$0x3] %vm180_vm2, %v1314_v46  ;;  %1262 = vmatmul.msk.f32.vlgmr.msra.gmra.mxu2 %vm89_vm1, %v1314_v46 }
 0x1ac   :  { %1315 = vtanh.f32 %v287_v47  ;;  %523 = vmatpush.msra.mxu2 %v1486_v2  ;;  %v567_v2 = vld [vmem:[%s1904_s7 + $0x10] sm:$0xff] }
 0x1ae   :  { %524 = vmatpush.msra.mxu2 %v1497_v5  ;;  %v399_v5 = vld [vmem:[#allocation2 + $0xa] sm:$0x3] }
 0x1b0   :  { %525 = vmatpush.msra.mxu2 %v1506_v7 }
 0x1b2   :  { %v1316_v48 = vpop.eup %1315  ;;  %526 = vmatpush.msra.mxu2 %v1518_v9 }
 0x1b3   :  { %290 = vst.msk [vmem:[#allocation5 + $0xa] sm:$0x3] %vm180_vm2, %v1316_v48  ;;  %1263 = vmatmul.msk.f32.vlgmr.msra.gmra.mxu3 %vm89_vm1, %v1316_v48  ;;  %v1741_v48 = vld [vmem:[%s1908_s11 + $0x8] sm:$0xff] }
 0x1b4   :  { %549 = vmatpush.msra.mxu3 %v1511_v8  ;;  %v425_v8 = vld [vmem:[#allocation3 + $0x4] sm:$0x3] }
 0x1b6   :  { %550 = vmatpush.msra.mxu3 %v1523_v10 }
 0x1b8   :  { %551 = vmatpush.msra.mxu3 %v1530_v11 }
 0x1ba   :  { %552 = vmatpush.msra.mxu3 %v1540_v12 }
 0x22e   :  { %v312_v50 = vpop.f32.mrf.mxu2 }
 0x22f   :  { %v315_v51 = vadd.f32 %v312_v50, %v291_v49  ;;  %v1746_v49 = vld [vmem:[%s1908_s11] sm:$0xff] }
 0x231   :  { %1317 = vtanh.f32 %v315_v51 }
 0x236   :  { %v338_v53 = vpop.f32.mrf.mxu3 }
 0x237   :  { %v1318_v54 = vpop.eup %1317  ;;  %v341_v55 = vadd.f32 %v338_v53, %v317_v52 }
 0x238   :  { %343 = vst.msk [vmem:[#allocation4 + $0x6] sm:$0x3] %vm180_vm2, %v1318_v54  ;;  %1264 = vmatmul.msk.f32.vlgmr.msra.gmra.mxu0 %vm89_vm1, %v1318_v54  ;;  %v1302_v54 = vld [vmem:[%s1906_s9] ss:$0 sm:$0xff] }
 0x239   :  { %1319 = vtanh.f32 %v341_v55  ;;  %591 = vmatpush.msra.mxu0 %v572_v28 }
 0x23b   :  { %592 = vmatpush.msra.mxu0 %v571_v30 }
 0x23d   :  { %593 = vmatpush.msra.mxu0 %v570_v32 }
 0x23f   :  { %v1320_v56 = vpop.eup %1319  ;;  %v561_v14 = vld [vmem:[#allocation4] sm:$0xff]  ;;  %594 = vmatpush.msra.mxu0 %v569_v34 }
 0x240   :  { %344 = vst.msk [vmem:[#allocation5 + $0x8] sm:$0x3] %vm180_vm2, %v1320_v56  ;;  %1265 = vmatmul.msk.f32.vlgmr.msra.gmra.mxu1 %vm89_vm1, %v1320_v56 }
 0x241   :  { %620 = vmatpush.msra.mxu1 %v568_v1 }
 0x243   :  { %621 = vmatpush.msra.mxu1 %v567_v2 }
 0x245   :  { %622 = vmatpush.msra.mxu1 %v566_v3 }
 0x247   :  { %623 = vmatpush.msra.mxu1 %v565_v4  ;;  %v564_v53 = vld [vmem:[#allocation5 + $0x8] sm:$0xff] }
 0x2b5   :  { %v366_v58 = vpop.f32.mrf.mxu0 }
 0x2b6   :  { %v369_v59 = vadd.f32 %v366_v58, %v345_v57 }
 0x2b8   :  { %1321 = vtanh.f32 %v369_v59 }
 0x2bd   :  { %v392_v61 = vpop.f32.mrf.mxu1 }
 0x2be   :  { %v1322_v62 = vpop.eup %1321  ;;  %v395_v63 = vadd.f32 %v392_v61, %v371_v60 }
 0x2bf   :  { %397 = vst.msk [vmem:[#allocation4 + $0x8] sm:$0x3] %vm180_vm2, %v1322_v62  ;;  %1266 = vmatmul.msk.f32.vlgmr.msrb.gmra.mxu2 %vm89_vm1, %v1322_v62 }
 0x2c0   :  { %1323 = vtanh.f32 %v395_v63  ;;  %659 = vmatpush.msrb.mxu2 %v646_v27 }
 0x2c2   :  { %660 = vmatpush.msrb.mxu2 %v645_v29 }
 0x2c4   :  { %661 = vmatpush.msrb.mxu2 %v644_v31 }
 0x2c6   :  { %v1324_v0 = vpop.eup %1323  ;;  %662 = vmatpush.msrb.mxu2 %v643_v33 }
 0x2c7   :  { %398 = vst.msk [vmem:[#allocation5 + $0x6] sm:$0x3] %vm180_vm2, %v1324_v0  ;;  %1267 = vmatmul.msk.f32.vlgmr.msrb.gmra.mxu3 %vm89_vm1, %v1324_v0 }
 0x2c8   :  { %682 = vmatpush.msrb.mxu3 %v642_v15 }
 0x2ca   :  { %683 = vmatpush.msrb.mxu3 %v641_v16 }
 0x2cc   :  { %684 = vmatpush.msrb.mxu3 %v640_v17 }
 0x2ce   :  { %685 = vmatpush.msrb.mxu3 %v639_v18 }
 0x342   :  { %v420_v6 = vpop.f32.mrf.mxu2 }
 0x343   :  { %v423_v7 = vadd.f32 %v420_v6, %v399_v5 }
 0x345   :  { %1325 = vtanh.f32 %v423_v7 }
 0x34a   :  { %v446_v9 = vpop.f32.mrf.mxu3 }
 0x34b   :  { %v1326_v10 = vpop.eup %1325  ;;  %v449_v11 = vadd.f32 %v446_v9, %v425_v8 }
 0x34c   :  { %451 = vst.msk [vmem:[#allocation4 + $0xa] sm:$0x3] %vm180_vm2, %v1326_v10  ;;  %1268 = vmatmul.msk.f32.vlgmr.msrb.gmra.mxu0 %vm89_vm1, %v1326_v10 }
 0x34d   :  { %1327 = vtanh.f32 %v449_v11  ;;  %722 = vmatpush.msrb.mxu0 %v1696_v38 }
 0x34f   :  { %723 = vmatpush.msrb.mxu0 %v1706_v40 }
 0x351   :  { %724 = vmatpush.msrb.mxu0 %v1718_v42 }
 0x353   :  { %v1328_v12 = vpop.eup %1327  ;;  %725 = vmatpush.msrb.mxu0 %v1727_v43 }
 0x354   :  { %452 = vst.msk [vmem:[#allocation5 + $0x4] sm:$0x3] %vm180_vm2, %v1328_v12  ;;  %1269 = vmatmul.msk.f32.vlgmr.msrb.gmra.mxu1 %vm89_vm1, %v1328_v12 }
 0x355   :  { %745 = vmatpush.msrb.mxu1 %v1701_v39 }
 0x357   :  { %746 = vmatpush.msrb.mxu1 %v1713_v41 }
 0x359   :  { %747 = vmatpush.msrb.mxu1 %v1741_v48 }
 0x35b   :  { %748 = vmatpush.msrb.mxu1 %v1746_v49 }
 0x35c   :  { %1274 = vmatmul.msk.f32.vlgmr.msra.gmra.mxu1 %vm89_vm1, %v561_v14 }
 0x35d   :  { %849 = vmatpush.msra.mxu1 %v1701_v39 }
 0x35f   :  { %850 = vmatpush.msra.mxu1 %v1713_v41 }
 0x361   :  { %851 = vmatpush.msra.mxu1 %v1741_v48 }
 0x363   :  { %852 = vmatpush.msra.mxu1 %v1746_v49 }
 0x3c9   :  { %v474_v20 = vpop.f32.mrf.mxu0 }
 0x3ca   :  { %v477_v21 = vadd.f32 %v474_v20, %v453_v19 }
 0x3cc   :  { %1329 = vtanh.f32 %v477_v21 }
 0x3d1   :  { %v500_v23 = vpop.f32.mrf.mxu1 }
 0x3d2   :  { %v1330_v24 = vpop.eup %1329  ;;  %v503_v25 = vadd.f32 %v500_v23, %v479_v22 }
 0x3d3   :  { %505 = vst.msk [vmem:[#allocation4 + $0xc] sm:$0x3] %vm180_vm2, %v1330_v24  ;;  %1270 = vmatmul.msk.f32.vlgmr.msra.gmra.mxu2 %vm89_vm1, %v1330_v24 }
 0x3d4   :  { %1331 = vtanh.f32 %v503_v25  ;;  %771 = vmatpush.msra.mxu2 %v1696_v38 }
 0x3d6   :  { %772 = vmatpush.msra.mxu2 %v1706_v40 }
 0x3d8   :  { %773 = vmatpush.msra.mxu2 %v1718_v42 }
 0x3d9   :  { %v625_v55 = vpop.f32.mrf.mxu1 }
 0x3da   :  { %v1332_v26 = vpop.eup %1331  ;;  %774 = vmatpush.msra.mxu2 %v1727_v43 }
 0x3db   :  { %506 = vst.msk [vmem:[#allocation5 + $0x2] sm:$0x3] %vm180_vm2, %v1332_v26  ;;  %1271 = vmatmul.msk.f32.vlgmr.msra.gmra.mxu3 %vm89_vm1, %v1332_v26 }
 0x3dc   :  { %797 = vmatpush.msra.mxu3 %v1701_v39 }
 0x3de   :  { %798 = vmatpush.msra.mxu3 %v1713_v41 }
 0x3e0   :  { %799 = vmatpush.msra.mxu3 %v1741_v48 }
 0x3e2   :  { %800 = vmatpush.msra.mxu3 %v1746_v49 }
 0x3e3   :  { %1278 = vmatmul.msk.f32.vlgmr.msrb.gmra.mxu3 %vm89_vm1, %v561_v14 }
 0x3e4   :  { %901 = vmatpush.msrb.mxu3 %v1701_v39 }
 0x3e6   :  { %902 = vmatpush.msrb.mxu3 %v1713_v41 }
 0x3e8   :  { %903 = vmatpush.msrb.mxu3 %v1741_v48 }
 0x3ea   :  { %904 = vmatpush.msrb.mxu3 %v1746_v49 }
 0x456   :  { %v528_v36 = vpop.f32.mrf.mxu2 }
 0x457   :  { %v531_v37 = vadd.f32 %v528_v36, %v507_v35 }
 0x459   :  { %1333 = vtanh.f32 %v531_v37 }
 0x45e   :  { %v554_v45 = vpop.f32.mrf.mxu3 }
 0x45f   :  { %v1733_v46 = vpop.eup %1333  ;;  %v557_v47 = vadd.f32 %v554_v45, %v533_v44 }
 0x460   :  { %559 = vst.msk [vmem:[#allocation4 + $0xe] sm:$0x3] %vm180_vm2, %v1733_v46 }
 0x461   :  { %1335 = vtanh.f32 %v557_v47 }
 0x466   :  { %v687_v59 = vpop.f32.mrf.mxu3 }
 0x467   :  { %v1757_v50 = vpop.eup %1335  ;;  %v562_v51 = vld [vmem:[#allocation4 + $0x8] sm:$0xff] }
 0x468   :  { %560 = vst.msk [vmem:[#allocation5] sm:$0x3] %vm180_vm2, %v1757_v50  ;;  %1275 = vmatmul.msk.f32.gmra.mxu1 %vm89_vm1, %v562_v51  ;;  %1279 = vmatmul.msk.f32.gmra.mxu3 %vm89_vm1, %v562_v51  ;;  %v1126_v51 = vld [vmem:[%s1910_s13 + $0x10] sm:$0xff] }
 0x46f   :  { %v563_v52 = vld [vmem:[#allocation5] sm:$0xff] }
 0x470   :  { %1272 = vmatmul.msk.f32.vlgmr.msra.gmra.mxu0 %vm89_vm1, %v563_v52  ;;  %1276 = vmatmul.msk.f32.vlgmr.msrb.gmra.mxu2 %vm89_vm1, %v563_v52  ;;  %v1125_v52 = vld [vmem:[%s1910_s13 + $0x8] sm:$0xff] }
 0x471   :  { %749 = vmatmul.f32.vlgmr.msrb.gmra.mxu1 %v1395_v13  ;;  %823 = vmatpush.msra.mxu0 %v1696_v38 }
 0x472   :  { %875 = vmatpush.msrb.mxu2 %v1696_v38  ;;  %953 = vmatpush.msrb.mxu1 %v1701_v39 }
 0x473   :  { %824 = vmatpush.msra.mxu0 %v1706_v40 }
 0x474   :  { %876 = vmatpush.msrb.mxu2 %v1706_v40  ;;  %954 = vmatpush.msrb.mxu1 %v1713_v41 }
 0x475   :  { %825 = vmatpush.msra.mxu0 %v1718_v42 }
 0x476   :  { %877 = vmatpush.msrb.mxu2 %v1718_v42  ;;  %955 = vmatpush.msrb.mxu1 %v1741_v48 }
 0x477   :  { %826 = vmatpush.msra.mxu0 %v1727_v43 }
 0x478   :  { %1273 = vmatmul.msk.f32.gmra.mxu0 %vm89_vm1, %v564_v53  ;;  %1277 = vmatmul.msk.f32.gmra.mxu2 %vm89_vm1, %v564_v53  ;;  %v1124_v53 = vld [vmem:[%s1910_s13] sm:$0xff] }
 0x479   :  { %878 = vmatpush.msrb.mxu2 %v1727_v43  ;;  %956 = vmatpush.msrb.mxu1 %v1746_v49 }
 0x480   :  { %726 = vmatmul.f32.vlgmr.msrb.gmra.mxu0 %v1395_v13  ;;  %v1303_v13 = vld [vmem:[%s1909_s12] ss:$0 sm:$0xff] }
 0x481   :  { %927 = vmatpush.msrb.mxu0 %v1696_v38 }
 0x483   :  { %928 = vmatpush.msrb.mxu0 %v1706_v40 }
 0x485   :  { %929 = vmatpush.msrb.mxu0 %v1718_v42 }
 0x487   :  { %930 = vmatpush.msrb.mxu0 %v1727_v43 }
 0x4e5   :  { %v628_v62 = vpop.f32.mrf.mxu1 }
 0x4eb   :  { %v690_v3 = vpop.f32.mrf.mxu3 }
 0x4ed   :  { %v596_v56 = vpop.f32.mrf.mxu0 }
 0x4ee   :  { %v626_v57 = vadd.f32 %v625_v55, %v596_v56  ;;  %v750_v10 = vpop.f32.mrf.mxu1  ;;  %v1154_v55 = vld [vmem:[%s1910_s13 + $0x30] sm:$0xff]  ;;  %v1153_v56 = vld [vmem:[%s1910_s13 + $0x28] sm:$0xff] }
 0x4f0   :  { %v635_v58 = vadd.f32 %v1302_v54, %v626_v57  ;;  %v1152_v57 = vld [vmem:[%s1910_s13 + $0x20] sm:$0xff] }
 0x4f2   :  { %637 = vst.msk [vmem:[#allocation2] sm:$0xff] %vm89_vm1, %v635_v58 }
 0x4f3   :  { %v664_v60 = vpop.f32.mrf.mxu2 }
 0x4f4   :  { %v688_v61 = vadd.f32 %v687_v59, %v664_v60 }
 0x4f5   :  { %v599_v63 = vpop.f32.mrf.mxu0 }
 0x4f6   :  { %v697_v0 = vadd.f32 %v1303_v13, %v688_v61  ;;  %v629_v1 = vadd.f32 %v628_v62, %v599_v63 }
 0x4f8   :  { %699 = vst.msk [vmem:[#allocation3] sm:$0xff] %vm89_vm1, %v697_v0  ;;  %v636_v2 = vadd.f32 %v1302_v54, %v629_v1  ;;  %v1155_v54 = vld [vmem:[%s1910_s13 + $0x38] sm:$0xff] }
 0x4f9   :  { %v709_v6 = vld [vmem:[#allocation2] sm:$0x3]  ;;  %v755_v16 = vld [vmem:[#allocation2 + $0x2] sm:$0x3]  ;;  %v807_v24 = vld [vmem:[#allocation2 + $0x4] sm:$0x3] }
 0x4fa   :  { %638 = vst.msk [vmem:[#allocation2 + $0x8] sm:$0xff] %vm89_vm1, %v636_v2  ;;  %v859_v32 = vld [vmem:[#allocation2 + $0x6] sm:$0x3] }
 0x4fb   :  { %v667_v4 = vpop.f32.mrf.mxu2 }
 0x4fc   :  { %v691_v5 = vadd.f32 %v690_v3, %v667_v4 }
 0x4fd   :  { %v727_v7 = vpop.f32.mrf.mxu0 }
 0x4fe   :  { %v698_v8 = vadd.f32 %v1303_v13, %v691_v5  ;;  %v730_v9 = vadd.f32 %v727_v7, %v709_v6 }
 0x4ff   :  { %v937_v44 = vld [vmem:[#allocation3 + $0x6] sm:$0x3]  ;;  %v989_v61 = vld [vmem:[#allocation3 + $0x4] sm:$0x3]  ;;  %v1041_v5 = vld [vmem:[#allocation3 + $0x2] sm:$0x3] }
 0x500   :  { %700 = vst.msk [vmem:[#allocation3 + $0x8] sm:$0xff] %vm89_vm1, %v698_v8  ;;  %1337 = vtanh.f32 %v730_v9  ;;  %v1181_v9 = vld [vmem:[%s1910_s13 + $0x48] sm:$0xff] }
 0x501   :  { %v963_v58 = vld [vmem:[#allocation2 + $0xa] sm:$0x3]  ;;  %v1015_v1 = vld [vmem:[#allocation2 + $0xc] sm:$0x3] }
 0x506   :  { %v1338_v11 = vpop.eup %1337 }
 0x507   :  { %v732_v12 = vld [vmem:[#allocation3 + $0xe] sm:$0x3]  ;;  %1280 = vmatmul.msk.f32.vlgmr.msra.gmra.mxu2 %vm89_vm1, %v1338_v11  ;;  %v781_v20 = vld [vmem:[#allocation3 + $0xc] sm:$0x3]  ;;  %v833_v28 = vld [vmem:[#allocation3 + $0xa] sm:$0x3] }
 0x508   :  { %v753_v14 = vadd.f32 %v750_v10, %v732_v12  ;;  %979 = vmatpush.msra.mxu2 %v1696_v38  ;;  %v885_v36 = vld [vmem:[#allocation3 + $0x8] sm:$0x3]  ;;  %v1180_v10 = vld [vmem:[%s1910_s13 + $0x40] sm:$0xff]  ;;  %v1210_v12 = vld [vmem:[%s1910_s13 + $0x70] sm:$0xff] }
 0x509   :  { %v1211_v11 = vld [vmem:[%s1910_s13 + $0x78] sm:$0xff] }
 0x50a   :  { %1339 = vtanh.f32 %v753_v14  ;;  %980 = vmatpush.msra.mxu2 %v1706_v40  ;;  %v1209_v14 = vld [vmem:[%s1910_s13 + $0x68] sm:$0xff] }
 0x50c   :  { %981 = vmatpush.msra.mxu2 %v1718_v42 }
 0x50e   :  { %982 = vmatpush.msra.mxu2 %v1727_v43 }
 0x510   :  { %v1340_v15 = vpop.eup %1339 }
 0x511   :  { %1281 = vmatmul.msk.f32.vlgmr.msra.gmra.mxu3 %vm89_vm1, %v1340_v15  ;;  %v1208_v15 = vld [vmem:[%s1910_s13 + $0x60] sm:$0xff] }
 0x512   :  { %1005 = vmatpush.msra.mxu3 %v1701_v39 }
 0x514   :  { %1006 = vmatpush.msra.mxu3 %v1713_v41 }
 0x516   :  { %1007 = vmatpush.msra.mxu3 %v1741_v48 }
 0x518   :  { %1008 = vmatpush.msra.mxu3 %v1746_v49 }
 0x58a   :  { %v776_v17 = vpop.f32.mrf.mxu2 }
 0x58b   :  { %v779_v18 = vadd.f32 %v776_v17, %v755_v16  ;;  %v1067_v16 = vld [vmem:[#allocation2 + $0xe] sm:$0x3] }
 0x58d   :  { %1341 = vtanh.f32 %v779_v18 }
 0x593   :  { %v1342_v19 = vpop.eup %1341 }
 0x594   :  { %v802_v21 = vpop.f32.mrf.mxu3  ;;  %1282 = vmatmul.msk.f32.vlgmr.msra.gmra.mxu0 %vm89_vm1, %v1342_v19 }
 0x595   :  { %v805_v22 = vadd.f32 %v802_v21, %v781_v20  ;;  %1031 = vmatpush.msra.mxu0 %v1696_v38  ;;  %v1093_v20 = vld [vmem:[#allocation3] sm:$0x3] }
 0x597   :  { %1343 = vtanh.f32 %v805_v22  ;;  %1032 = vmatpush.msra.mxu0 %v1706_v40 }
 0x599   :  { %1033 = vmatpush.msra.mxu0 %v1718_v42 }
 0x59b   :  { %1034 = vmatpush.msra.mxu0 %v1727_v43 }
 0x59d   :  { %v1344_v23 = vpop.eup %1343 }
 0x59e   :  { %1283 = vmatmul.msk.f32.vlgmr.msra.gmra.mxu1 %vm89_vm1, %v1344_v23 }
 0x59f   :  { %1057 = vmatpush.msra.mxu1 %v1701_v39 }
 0x5a1   :  { %1058 = vmatpush.msra.mxu1 %v1713_v41 }
 0x5a3   :  { %1059 = vmatpush.msra.mxu1 %v1741_v48 }
 0x5a5   :  { %1060 = vmatpush.msra.mxu1 %v1746_v49 }
 0x611   :  { %v828_v25 = vpop.f32.mrf.mxu0 }
 0x612   :  { %v831_v26 = vadd.f32 %v828_v25, %v807_v24  ;;  %v1304_v24 = vld [vmem:[%s1911_s14] ss:$0 sm:$0xff] }
 0x614   :  { %1345 = vtanh.f32 %v831_v26 }
 0x61a   :  { %v1346_v27 = vpop.eup %1345 }
 0x61b   :  { %v854_v29 = vpop.f32.mrf.mxu1  ;;  %1284 = vmatmul.msk.f32.vlgmr.msrb.gmra.mxu2 %vm89_vm1, %v1346_v27 }
 0x61c   :  { %v857_v30 = vadd.f32 %v854_v29, %v833_v28  ;;  %1083 = vmatpush.msrb.mxu2 %v1696_v38 }
 0x61e   :  { %1347 = vtanh.f32 %v857_v30  ;;  %1084 = vmatpush.msrb.mxu2 %v1706_v40 }
 0x620   :  { %1085 = vmatpush.msrb.mxu2 %v1718_v42 }
 0x622   :  { %1086 = vmatpush.msrb.mxu2 %v1727_v43 }
 0x624   :  { %v1348_v31 = vpop.eup %1347 }
 0x625   :  { %1285 = vmatmul.msk.f32.vlgmr.msrb.gmra.mxu3 %vm89_vm1, %v1348_v31 }
 0x626   :  { %1109 = vmatpush.msrb.mxu3 %v1701_v39  ;;  %v911_v39 = vld [vmem:[#allocation2 + $0x8] sm:$0x3] }
 0x628   :  { %1110 = vmatpush.msrb.mxu3 %v1713_v41 }
 0x62a   :  { %1111 = vmatpush.msrb.mxu3 %v1741_v48 }
 0x62c   :  { %1112 = vmatpush.msrb.mxu3 %v1746_v49  ;;  %v1127_v49 = vld [vmem:[%s1910_s13 + $0x18] sm:$0xff] }
 0x69e   :  { %v880_v33 = vpop.f32.mrf.mxu2 }
 0x69f   :  { %v883_v34 = vadd.f32 %v880_v33, %v859_v32 }
 0x6a1   :  { %1349 = vtanh.f32 %v883_v34 }
 0x6a7   :  { %v1350_v35 = vpop.eup %1349 }
 0x6a8   :  { %v906_v37 = vpop.f32.mrf.mxu3  ;;  %1286 = vmatmul.msk.f32.vlgmr.msrb.gmra.mxu0 %vm89_vm1, %v1350_v35 }
 0x6a9   :  { %v909_v38 = vadd.f32 %v906_v37, %v885_v36  ;;  %1143 = vmatpush.msrb.mxu0 %v1127_v49 }
 0x6ab   :  { %1351 = vtanh.f32 %v909_v38  ;;  %1144 = vmatpush.msrb.mxu0 %v1126_v51 }
 0x6ad   :  { %1145 = vmatpush.msrb.mxu0 %v1125_v52 }
 0x6af   :  { %1146 = vmatpush.msrb.mxu0 %v1124_v53 }
 0x6b1   :  { %v1352_v40 = vpop.eup %1351 }
 0x6b2   :  { %1287 = vmatmul.msk.f32.vlgmr.msrb.gmra.mxu1 %vm89_vm1, %v1352_v40 }
 0x6b3   :  { %1171 = vmatpush.msrb.mxu1 %v1155_v54 }
 0x6b5   :  { %1172 = vmatpush.msrb.mxu1 %v1154_v55 }
 0x6b7   :  { %1173 = vmatpush.msrb.mxu1 %v1153_v56 }
 0x6b9   :  { %1174 = vmatpush.msrb.mxu1 %v1152_v57 }
 0x725   :  { %v932_v41 = vpop.f32.mrf.mxu0 }
 0x726   :  { %v935_v42 = vadd.f32 %v932_v41, %v911_v39 }
 0x728   :  { %1353 = vtanh.f32 %v935_v42 }
 0x72e   :  { %v1354_v43 = vpop.eup %1353 }
 0x72f   :  { %v958_v45 = vpop.f32.mrf.mxu1  ;;  %1288 = vmatmul.msk.f32.vlgmr.msra.gmra.mxu2 %vm89_vm1, %v1354_v43 }
 0x730   :  { %v961_v47 = vadd.f32 %v958_v45, %v937_v44 }
 0x732   :  { %1355 = vtanh.f32 %v961_v47 }
 0x738   :  { %v1356_v48 = vpop.eup %1355 }
 0x739   :  { %1289 = vmatmul.msk.f32.vlgmr.msra.gmra.mxu3 %vm89_vm1, %v1356_v48 }
 0x73a   :  { %1227 = vmatpush.msra.mxu3 %v1211_v11 }
 0x73c   :  { %1228 = vmatpush.msra.mxu3 %v1210_v12 }
 0x73e   :  { %1229 = vmatpush.msra.mxu3 %v1209_v14 }
 0x740   :  { %1230 = vmatpush.msra.mxu3 %v1208_v15 }
 0x7b2   :  { %v984_v13 = vpop.f32.mrf.mxu2 }
 0x7b3   :  { %v987_v59 = vadd.f32 %v984_v13, %v963_v58 }
 0x7b5   :  { %1357 = vtanh.f32 %v987_v59 }
 0x7bb   :  { %v1358_v60 = vpop.eup %1357 }
 0x7bc   :  { %v1010_v62 = vpop.f32.mrf.mxu3  ;;  %1290 = vmatmul.msk.f32.vlgmr.msra.gmra.mxu0 %vm89_vm1, %v1358_v60 }
 0x7bd   :  { %v1013_v63 = vadd.f32 %v1010_v62, %v989_v61 }
 0x7bf   :  { %1359 = vtanh.f32 %v1013_v63 }
 0x7c4   :  { %1294 = vmatmul.msk.f32.vlgmr.msrb.gmra.mxu0 %vm89_vm1, %v1733_v46  ;;  %v1183_v46 = vld [vmem:[%s1910_s13 + $0x58] sm:$0xff] }
 0x7c5   :  { %v1360_v0 = vpop.eup %1359  ;;  %1199 = vmatpush.msra.mxu2 %v1183_v46 }
 0x7c6   :  { %1291 = vmatmul.msk.f32.vlgmr.msra.gmra.mxu1 %vm89_vm1, %v1360_v0 }
 0x7ce   :  { %1295 = vmatmul.msk.f32.vlgmr.msrb.gmra.mxu1 %vm89_vm1, %v1757_v50  ;;  %v1182_v50 = vld [vmem:[%s1910_s13 + $0x50] sm:$0xff]  ;;  %s1396_s13 = smov [#allocation6]  }
 0x7cf   :  { %1200 = vmatpush.msra.mxu2 %v1182_v50  ;;  %s1243_s19 = sshll.u32 %s1396_s13, 4  ;;  %s1244_s19 = int_to_ptr.vmem [resolvable:$true] %s1243_s19 }
 0x7d1   :  { %1201 = vmatpush.msra.mxu2 %v1181_v9 }
 0x7d3   :  { %1202 = vmatpush.msra.mxu2 %v1180_v10 }
 0x839   :  { %v1036_v2 = vpop.f32.mrf.mxu0 }
 0x83a   :  { %v1039_v3 = vadd.f32 %v1036_v2, %v1015_v1 }
 0x83c   :  { %1361 = vtanh.f32 %v1039_v3 }
 0x841   :  { %v1148_v25 = vpop.f32.mrf.mxu0 }
 0x842   :  { %v1362_v4 = vpop.eup %1361  ;;  %v1151_v27 = vadd.f32 %v1304_v24, %v1148_v25 }
 0x843   :  { %v1062_v6 = vpop.f32.mrf.mxu1  ;;  %1292 = vmatmul.msk.f32.vlgmr.msrb.gmra.mxu2 %vm89_vm1, %v1362_v4 }
 0x844   :  { %v1065_v7 = vadd.f32 %v1062_v6, %v1041_v5 }
 0x846   :  { %1363 = vtanh.f32 %v1065_v7 }
 0x84b   :  { %v1176_v26 = vpop.f32.mrf.mxu1 }
 0x84c   :  { %v1364_v8 = vpop.eup %1363  ;;  %v1179_v29 = vadd.f32 %v1176_v26, %v1151_v27 }
 0x84d   :  { %1293 = vmatmul.msk.f32.vlgmr.msrb.gmra.mxu3 %vm89_vm1, %v1364_v8 }
 0x8c6   :  { %v1088_v17 = vpop.f32.mrf.mxu2 }
 0x8c7   :  { %v1091_v18 = vadd.f32 %v1088_v17, %v1067_v16 }
 0x8c9   :  { %1365 = vtanh.f32 %v1091_v18 }
 0x8cf   :  { %v1366_v19 = vpop.eup %1365 }
 0x8d0   :  { %v1114_v21 = vpop.f32.mrf.mxu3  ;;  %1296 = vmatmul.msk.f32.vlgmr.msra.gmra.mxu2 %vm89_vm1, %v1366_v19 }
 0x8d1   :  { %v1117_v22 = vadd.f32 %v1114_v21, %v1093_v20 }
 0x8d3   :  { %1367 = vtanh.f32 %v1117_v22 }
 0x8d9   :  { %v1368_v23 = vpop.eup %1367 }
 0x8da   :  { %1297 = vmatmul.msk.f32.vlgmr.msra.gmra.mxu3 %vm89_vm1, %v1368_v23 }
 0x953   :  { %v1204_v28 = vpop.f32.mrf.mxu2 }
 0x954   :  { %v1207_v30 = vadd.f32 %v1204_v28, %v1179_v29 }
 0x95d   :  { %v1232_v31 = vpop.f32.mrf.mxu3 }
 0x95e   :  { %v1235_v32 = vadd.f32 %v1232_v31, %v1207_v30 }
 0x960   :  { %1237 = vst.msk [vmem:[#allocation6] sm:$0x3] %vm1236_vm3, %v1235_v32 }
 0x961   :  { %1248 = dma.vmem_to_hbm [thread:$0]  %s1244_s19, 32, %s1246_s22, [#allocation7]  }
 0x962   :  { %1393 = dma.done.wait [#allocation7], 32  }
 0x963   :  { %1394 = vsyncadd [#allocation7], 4294967264 }
 0x964   :  { %1253 = vsyncpa [#allocation7], 1 }

</bundles_post_ra>
